<compile_context>
chip_gen: v5e
topology: v5e:2x2
jax: 0.10.0
libtpu: 0.0.40
codegen_flags: <defaults>
</compile_context>

<pallas_src>
import jax
import jax.numpy as jnp
from jax.experimental import pallas as pl
from jax.experimental.pallas import tpu as pltpu

LN_EPS = 1e-5  # PyTorch LayerNorm default


def _layernorm(h, gamma, beta):
    # One-pass stats: both cross-lane reductions depend only on h (shorter
    # XLU->VPU->XLU chain), biased variance like PyTorch.
    m = jnp.mean(h, axis=-1, keepdims=True)
    m2 = jnp.mean(h * h, axis=-1, keepdims=True)
    var = jnp.maximum(m2 - m * m, 0.0)
    inv = jax.lax.rsqrt(var + LN_EPS)
    return (h - m) * (inv * gamma) + beta


def predictor_kernel(
    x_ref,
    w1_ref, b1_ref, g1_ref, be1_ref,
    w2_ref, b2_ref, g2_ref, be2_ref,
    w3_ref, b3_ref,
    o_ref,
):
    # bf16 operands on the MXU, f32 accumulation; elementwise math stays f32.
    x16 = x_ref[...].astype(jnp.bfloat16)

    # Linear 1 + LayerNorm + ReLU
    h = jnp.dot(x16, w1_ref[...], preferred_element_type=jnp.float32) + b1_ref[...]
    h = jnp.maximum(_layernorm(h, g1_ref[...], be1_ref[...]), 0.0)

    # Linear 2 + LayerNorm + ReLU
    h = jnp.dot(h.astype(jnp.bfloat16), w2_ref[...],
                preferred_element_type=jnp.float32) + b2_ref[...]
    h = jnp.maximum(_layernorm(h, g2_ref[...], be2_ref[...]), 0.0)

    # Linear 3, lane-dense: contract w3 (hh, out_dim) dim 0 with h (TM, hh) dim 1
    # -> (out_dim, TM) so the batch tile lives on the 128-lane axis (unmasked vst).
    y = jax.lax.dot_general(
        w3_ref[...], h.astype(jnp.bfloat16),
        dimension_numbers=(((0,), (1,)), ((), ())),
        preferred_element_type=jnp.float32,
    ) + b3_ref[...]                       # b3 is (out_dim, 1), broadcasts over lanes
    o_ref[...] = y.astype(o_ref.dtype)


def _round_up(n, m):
    return ((n + m - 1) // m) * m


def predictor_forward(x, params, tm=1024):
    """x: (B, input_dim) float32. Returns flattened (B * output_dim,) f32 vector."""
    B, input_dim = x.shape
    out_dim = params["w3"].shape[1]

    # Batch tile: multiple of 128 (it becomes the lane axis of the output block).
    # Large TM amortizes the ~0.35us per-grid-step overhead; VMEM cost is tiny
    # for these narrow feature dims (TM * input_dim * 4B double-buffered).
    tm = min(tm, _round_up(B, 128))
    b_pad = _round_up(B, tm)
    if b_pad != B:
        x = jnp.pad(x, ((0, b_pad - B), (0, 0)))
    grid = (b_pad // tm,)

    def resident(arr):  # weights / LN params: DMA'd once, resident across all steps
        return pl.BlockSpec(arr.shape, lambda i: (0,) * arr.ndim)

    in_specs = [
        pl.BlockSpec((tm, input_dim), lambda i: (i, 0)),   # x streamed per batch tile
        resident(params["w1"]), resident(params["b1"]),
        resident(params["g1"]), resident(params["be1"]),
        resident(params["w2"]), resident(params["b2"]),
        resident(params["g2"]), resident(params["be2"]),
        resident(params["w3"]), resident(params["b3"]),
    ]
    out_specs = pl.BlockSpec((out_dim, tm), lambda i: (0, i))

    y_t = pl.pallas_call(
        predictor_kernel,
        out_shape=jax.ShapeDtypeStruct((out_dim, b_pad), jnp.float32),
        grid=grid,
        in_specs=in_specs,
        out_specs=out_specs,
        compiler_params=pltpu.CompilerParams(
            dimension_semantics=("parallel",),   # shard batch tiles across TCs
        ),
    )(x,
      params["w1"], params["b1"], params["g1"], params["be1"],
      params["w2"], params["b2"], params["g2"], params["be2"],
      params["w3"], params["b3"])

    # y_t is (out_dim, B_pad); PyTorch returns row-major per-sample flatten.
    return y_t[:, :B].T.reshape(-1)


def init_params(key, input_dim, hidden_dim, output_dim):
    hh = hidden_dim // 2
    ks = jax.random.split(key, 6)
    s1 = 1.0 / jnp.sqrt(input_dim)
    s2 = 1.0 / jnp.sqrt(hh)
    u = jax.random.uniform
    return {
        # Linear 1: input_dim -> hh  (matmul weights stored bf16 for the MXU)
        "w1": u(ks[0], (input_dim, hh), jnp.float32, -s1, s1).astype(jnp.bfloat16),
        "b1": u(ks[1], (1, hh), jnp.float32, -s1, s1),
        "g1": jnp.ones((1, hh), jnp.float32),
        "be1": jnp.zeros((1, hh), jnp.float32),
        # Linear 2: hh -> hh
        "w2": u(ks[2], (hh, hh), jnp.float32, -s2, s2).astype(jnp.bfloat16),
        "b2": u(ks[3], (1, hh), jnp.float32, -s2, s2),
        "g2": jnp.ones((1, hh), jnp.float32),
        "be2": jnp.zeros((1, hh), jnp.float32),
        # Linear 3: hh -> output_dim  (bias stored as a column for lane-dense add)
        "w3": u(ks[4], (hh, output_dim), jnp.float32, -s2, s2).astype(jnp.bfloat16),
        "b3": u(ks[5], (output_dim, 1), jnp.float32, -s2, s2),
    }


def reference_forward(x, p):
    # Pure-JAX reference mirroring the kernel math (bf16 operands, f32 accum).
    h = jnp.dot(x.astype(jnp.bfloat16), p["w1"],
                preferred_element_type=jnp.float32) + p["b1"]
    h = jnp.maximum(_layernorm(h, p["g1"], p["be1"]), 0.0)
    h = jnp.dot(h.astype(jnp.bfloat16), p["w2"],
                preferred_element_type=jnp.float32) + p["b2"]
    h = jnp.maximum(_layernorm(h, p["g2"], p["be2"]), 0.0)
    y = jnp.dot(h.astype(jnp.bfloat16), p["w3"],
                preferred_element_type=jnp.float32) + p["b3"].T
    return y.reshape(-1)


if __name__ == "__main__":
    # NOTE: with input_dim=16, hh=16, out_dim=4 the utilization ceiling is set by
    # the sub-128 feature dims; the grid/layout choices above are what matters
    # once B grows (streamed batch tiles, resident weights, lane-dense stores).
    input_dim, hidden_dim, output_dim = 16, 32, 4
    batch = 8

    key = jax.random.PRNGKey(0)
    kx, kp = jax.random.split(key)
    x = jax.random.normal(kx, (batch, input_dim), jnp.float32)
    params = init_params(kp, input_dim, hidden_dim, output_dim)

    out = jax.block_until_ready(predictor_forward(x, params))
    ref = reference_forward(x, params)

    assert out.shape == (batch * output_dim,), out.shape
    assert jnp.allclose(out, ref, atol=2e-3, rtol=2e-3), (
        float(jnp.max(jnp.abs(out - ref)))
    )
    print("KERNEL_OK")
</pallas_src>

<mosaic_0001>
module attributes {stable_mosaic.version = 11 : i64} {
  func.func @predictor_kernel(%arg0: i32, %arg1: memref<128x16xf32, #tpu.memory_space<vmem>>, %arg2: memref<16x16xbf16, #tpu.memory_space<vmem>>, %arg3: memref<1x16xf32, #tpu.memory_space<vmem>>, %arg4: memref<1x16xf32, #tpu.memory_space<vmem>>, %arg5: memref<1x16xf32, #tpu.memory_space<vmem>>, %arg6: memref<16x16xbf16, #tpu.memory_space<vmem>>, %arg7: memref<1x16xf32, #tpu.memory_space<vmem>>, %arg8: memref<1x16xf32, #tpu.memory_space<vmem>>, %arg9: memref<1x16xf32, #tpu.memory_space<vmem>>, %arg10: memref<16x4xbf16, #tpu.memory_space<vmem>>, %arg11: memref<4x1xf32, #tpu.memory_space<vmem>>, %arg12: memref<4x128xf32, #tpu.memory_space<vmem>>) attributes {dimension_semantics = [#tpu.dimension_semantics<parallel>], iteration_bounds = array<i64: 1>, scalar_prefetch = 0 : i64, scratch_operands = 0 : i64, tpu.core_type = #tpu.core_type<tc>, window_params = [{transform_indices = @transform_0, window_bounds = array<i64: 128, 16>}, {pipeline_mode = #tpu.pipeline_mode<synchronous>, transform_indices = @transform_1, window_bounds = array<i64: 16, 16>}, {pipeline_mode = #tpu.pipeline_mode<synchronous>, transform_indices = @transform_2, window_bounds = array<i64: 1, 16>}, {pipeline_mode = #tpu.pipeline_mode<synchronous>, transform_indices = @transform_3, window_bounds = array<i64: 1, 16>}, {pipeline_mode = #tpu.pipeline_mode<synchronous>, transform_indices = @transform_4, window_bounds = array<i64: 1, 16>}, {pipeline_mode = #tpu.pipeline_mode<synchronous>, transform_indices = @transform_5, window_bounds = array<i64: 16, 16>}, {pipeline_mode = #tpu.pipeline_mode<synchronous>, transform_indices = @transform_6, window_bounds = array<i64: 1, 16>}, {pipeline_mode = #tpu.pipeline_mode<synchronous>, transform_indices = @transform_7, window_bounds = array<i64: 1, 16>}, {pipeline_mode = #tpu.pipeline_mode<synchronous>, transform_indices = @transform_8, window_bounds = array<i64: 1, 16>}, {pipeline_mode = #tpu.pipeline_mode<synchronous>, transform_indices = @transform_9, window_bounds = array<i64: 16, 4>}, {pipeline_mode = #tpu.pipeline_mode<synchronous>, transform_indices = @transform_10, window_bounds = array<i64: 4, 1>}, {transform_indices = @transform_11, window_bounds = array<i64: 4, 128>}]} {
    %c0 = arith.constant 0 : index
    %c0_0 = arith.constant 0 : index
    %0 = vector.load %arg1[%c0, %c0_0] : memref<128x16xf32, #tpu.memory_space<vmem>>, vector<128x16xf32>
    %1 = arith.truncf %0 : vector<128x16xf32> to vector<128x16xbf16>
    %c0_1 = arith.constant 0 : index
    %c0_2 = arith.constant 0 : index
    %2 = vector.load %arg2[%c0_1, %c0_2] : memref<16x16xbf16, #tpu.memory_space<vmem>>, vector<16x16xbf16>
    %cst = arith.constant dense<0.000000e+00> : vector<128x16xf32>
    %3 = tpu.matmul %1, %2, %cst {dimension_numbers = #tpu.dot_dimension_numbers<[1], [0], [0], [1], [0, 0, 1, 1], [], []>} : vector<128x16xbf16>, vector<16x16xbf16>, vector<128x16xf32> -> vector<128x16xf32>
    %c0_3 = arith.constant 0 : index
    %c0_4 = arith.constant 0 : index
    %4 = vector.load %arg3[%c0_3, %c0_4] : memref<1x16xf32, #tpu.memory_space<vmem>>, vector<1x16xf32>
    %5 = vector.broadcast %4 : vector<1x16xf32> to vector<128x16xf32>
    %6 = arith.addf %3, %5 : vector<128x16xf32>
    %c0_5 = arith.constant 0 : index
    %c0_6 = arith.constant 0 : index
    %7 = vector.load %arg4[%c0_5, %c0_6] : memref<1x16xf32, #tpu.memory_space<vmem>>, vector<1x16xf32>
    %c0_7 = arith.constant 0 : index
    %c0_8 = arith.constant 0 : index
    %8 = vector.load %arg5[%c0_7, %c0_8] : memref<1x16xf32, #tpu.memory_space<vmem>>, vector<1x16xf32>
    %cst_9 = arith.constant dense<0.000000e+00> : vector<128xf32>
    %9 = vector.multi_reduction <add>, %6, %cst_9 [1] : vector<128x16xf32> to vector<128xf32>
    %10 = vector.shape_cast %9 : vector<128xf32> to vector<128x1xf32>
    %cst_10 = arith.constant 1.600000e+01 : f32
    %11 = vector.broadcast %cst_10 : f32 to vector<128x1xf32>
    %12 = arith.divf %10, %11 : vector<128x1xf32>
    %13 = arith.mulf %6, %6 : vector<128x16xf32>
    %cst_11 = arith.constant dense<0.000000e+00> : vector<128xf32>
    %14 = vector.multi_reduction <add>, %13, %cst_11 [1] : vector<128x16xf32> to vector<128xf32>
    %15 = vector.shape_cast %14 : vector<128xf32> to vector<128x1xf32>
    %cst_12 = arith.constant 1.600000e+01 : f32
    %16 = vector.broadcast %cst_12 : f32 to vector<128x1xf32>
    %17 = arith.divf %15, %16 : vector<128x1xf32>
    %18 = arith.mulf %12, %12 : vector<128x1xf32>
    %19 = arith.subf %17, %18 : vector<128x1xf32>
    %cst_13 = arith.constant 0.000000e+00 : f32
    %20 = vector.broadcast %cst_13 : f32 to vector<128x1xf32>
    %21 = arith.maximumf %19, %20 : vector<128x1xf32>
    %cst_14 = arith.constant 9.99999974E-6 : f32
    %22 = vector.broadcast %cst_14 : f32 to vector<128x1xf32>
    %23 = arith.addf %21, %22 : vector<128x1xf32>
    %24 = math.rsqrt %23 : vector<128x1xf32>
    %25 = vector.broadcast %12 : vector<128x1xf32> to vector<128x16xf32>
    %26 = arith.subf %6, %25 : vector<128x16xf32>
    %27 = vector.broadcast %24 : vector<128x1xf32> to vector<128x16xf32>
    %28 = vector.broadcast %7 : vector<1x16xf32> to vector<128x16xf32>
    %29 = arith.mulf %27, %28 : vector<128x16xf32>
    %30 = arith.mulf %26, %29 : vector<128x16xf32>
    %31 = vector.broadcast %8 : vector<1x16xf32> to vector<128x16xf32>
    %32 = arith.addf %30, %31 : vector<128x16xf32>
    %cst_15 = arith.constant 0.000000e+00 : f32
    %33 = vector.broadcast %cst_15 : f32 to vector<128x16xf32>
    %34 = arith.maximumf %32, %33 : vector<128x16xf32>
    %35 = arith.truncf %34 : vector<128x16xf32> to vector<128x16xbf16>
    %c0_16 = arith.constant 0 : index
    %c0_17 = arith.constant 0 : index
    %36 = vector.load %arg6[%c0_16, %c0_17] : memref<16x16xbf16, #tpu.memory_space<vmem>>, vector<16x16xbf16>
    %cst_18 = arith.constant dense<0.000000e+00> : vector<128x16xf32>
    %37 = tpu.matmul %35, %36, %cst_18 {dimension_numbers = #tpu.dot_dimension_numbers<[1], [0], [0], [1], [0, 0, 1, 1], [], []>} : vector<128x16xbf16>, vector<16x16xbf16>, vector<128x16xf32> -> vector<128x16xf32>
    %c0_19 = arith.constant 0 : index
    %c0_20 = arith.constant 0 : index
    %38 = vector.load %arg7[%c0_19, %c0_20] : memref<1x16xf32, #tpu.memory_space<vmem>>, vector<1x16xf32>
    %39 = vector.broadcast %38 : vector<1x16xf32> to vector<128x16xf32>
    %40 = arith.addf %37, %39 : vector<128x16xf32>
    %c0_21 = arith.constant 0 : index
    %c0_22 = arith.constant 0 : index
    %41 = vector.load %arg8[%c0_21, %c0_22] : memref<1x16xf32, #tpu.memory_space<vmem>>, vector<1x16xf32>
    %c0_23 = arith.constant 0 : index
    %c0_24 = arith.constant 0 : index
    %42 = vector.load %arg9[%c0_23, %c0_24] : memref<1x16xf32, #tpu.memory_space<vmem>>, vector<1x16xf32>
    %cst_25 = arith.constant dense<0.000000e+00> : vector<128xf32>
    %43 = vector.multi_reduction <add>, %40, %cst_25 [1] : vector<128x16xf32> to vector<128xf32>
    %44 = vector.shape_cast %43 : vector<128xf32> to vector<128x1xf32>
    %cst_26 = arith.constant 1.600000e+01 : f32
    %45 = vector.broadcast %cst_26 : f32 to vector<128x1xf32>
    %46 = arith.divf %44, %45 : vector<128x1xf32>
    %47 = arith.mulf %40, %40 : vector<128x16xf32>
    %cst_27 = arith.constant dense<0.000000e+00> : vector<128xf32>
    %48 = vector.multi_reduction <add>, %47, %cst_27 [1] : vector<128x16xf32> to vector<128xf32>
    %49 = vector.shape_cast %48 : vector<128xf32> to vector<128x1xf32>
    %cst_28 = arith.constant 1.600000e+01 : f32
    %50 = vector.broadcast %cst_28 : f32 to vector<128x1xf32>
    %51 = arith.divf %49, %50 : vector<128x1xf32>
    %52 = arith.mulf %46, %46 : vector<128x1xf32>
    %53 = arith.subf %51, %52 : vector<128x1xf32>
    %cst_29 = arith.constant 0.000000e+00 : f32
    %54 = vector.broadcast %cst_29 : f32 to vector<128x1xf32>
    %55 = arith.maximumf %53, %54 : vector<128x1xf32>
    %cst_30 = arith.constant 9.99999974E-6 : f32
    %56 = vector.broadcast %cst_30 : f32 to vector<128x1xf32>
    %57 = arith.addf %55, %56 : vector<128x1xf32>
    %58 = math.rsqrt %57 : vector<128x1xf32>
    %59 = vector.broadcast %46 : vector<128x1xf32> to vector<128x16xf32>
    %60 = arith.subf %40, %59 : vector<128x16xf32>
    %61 = vector.broadcast %58 : vector<128x1xf32> to vector<128x16xf32>
    %62 = vector.broadcast %41 : vector<1x16xf32> to vector<128x16xf32>
    %63 = arith.mulf %61, %62 : vector<128x16xf32>
    %64 = arith.mulf %60, %63 : vector<128x16xf32>
    %65 = vector.broadcast %42 : vector<1x16xf32> to vector<128x16xf32>
    %66 = arith.addf %64, %65 : vector<128x16xf32>
    %cst_31 = arith.constant 0.000000e+00 : f32
    %67 = vector.broadcast %cst_31 : f32 to vector<128x16xf32>
    %68 = arith.maximumf %66, %67 : vector<128x16xf32>
    %c0_32 = arith.constant 0 : index
    %c0_33 = arith.constant 0 : index
    %69 = vector.load %arg10[%c0_32, %c0_33] : memref<16x4xbf16, #tpu.memory_space<vmem>>, vector<16x4xbf16>
    %70 = arith.truncf %68 : vector<128x16xf32> to vector<128x16xbf16>
    %cst_34 = arith.constant dense<0.000000e+00> : vector<4x128xf32>
    %71 = tpu.matmul %69, %70, %cst_34 {dimension_numbers = #tpu.dot_dimension_numbers<[0], [1], [1], [0], [0, 1, 1, 0], [], []>} : vector<16x4xbf16>, vector<128x16xbf16>, vector<4x128xf32> -> vector<4x128xf32>
    %c0_35 = arith.constant 0 : index
    %c0_36 = arith.constant 0 : index
    %72 = vector.load %arg11[%c0_35, %c0_36] : memref<4x1xf32, #tpu.memory_space<vmem>>, vector<4x1xf32>
    %73 = vector.broadcast %72 : vector<4x1xf32> to vector<4x128xf32>
    %74 = arith.addf %71, %73 : vector<4x128xf32>
    %c0_37 = arith.constant 0 : index
    %c0_38 = arith.constant 0 : index
    %75 = vector.load %arg12[%c0_37, %c0_38] : memref<4x128xf32, #tpu.memory_space<vmem>>, vector<4x128xf32>
    tpu.vector_store %arg12[%c0_37, %c0_38], %74 {strides = array<i32>} : memref<4x128xf32, #tpu.memory_space<vmem>>, vector<4x128xf32>,
    return
  }
  func.func @transform_0(%arg0: i32) -> (i32, i32) {
    %c0_i32 = arith.constant 0 : i32
    %c0_i32_0 = arith.constant 0 : i32
    return %arg0, %c0_i32 : i32, i32
  }
  func.func @transform_1(%arg0: i32) -> (i32, i32) {
    %c0_i32 = arith.constant 0 : i32
    %c0_i32_0 = arith.constant 0 : i32
    %c0_i32_1 = arith.constant 0 : i32
    return %c0_i32, %c0_i32_0 : i32, i32
  }
  func.func @transform_2(%arg0: i32) -> (i32, i32) {
    %c0_i32 = arith.constant 0 : i32
    %c0_i32_0 = arith.constant 0 : i32
    %c0_i32_1 = arith.constant 0 : i32
    return %c0_i32, %c0_i32_0 : i32, i32
  }
  func.func @transform_3(%arg0: i32) -> (i32, i32) {
    %c0_i32 = arith.constant 0 : i32
    %c0_i32_0 = arith.constant 0 : i32
    %c0_i32_1 = arith.constant 0 : i32
    return %c0_i32, %c0_i32_0 : i32, i32
  }
  func.func @transform_4(%arg0: i32) -> (i32, i32) {
    %c0_i32 = arith.constant 0 : i32
    %c0_i32_0 = arith.constant 0 : i32
    %c0_i32_1 = arith.constant 0 : i32
    return %c0_i32, %c0_i32_0 : i32, i32
  }
  func.func @transform_5(%arg0: i32) -> (i32, i32) {
    %c0_i32 = arith.constant 0 : i32
    %c0_i32_0 = arith.constant 0 : i32
    %c0_i32_1 = arith.constant 0 : i32
    return %c0_i32, %c0_i32_0 : i32, i32
  }
  func.func @transform_6(%arg0: i32) -> (i32, i32) {
    %c0_i32 = arith.constant 0 : i32
    %c0_i32_0 = arith.constant 0 : i32
    %c0_i32_1 = arith.constant 0 : i32
    return %c0_i32, %c0_i32_0 : i32, i32
  }
  func.func @transform_7(%arg0: i32) -> (i32, i32) {
    %c0_i32 = arith.constant 0 : i32
    %c0_i32_0 = arith.constant 0 : i32
    %c0_i32_1 = arith.constant 0 : i32
    return %c0_i32, %c0_i32_0 : i32, i32
  }
  func.func @transform_8(%arg0: i32) -> (i32, i32) {
    %c0_i32 = arith.constant 0 : i32
    %c0_i32_0 = arith.constant 0 : i32
    %c0_i32_1 = arith.constant 0 : i32
    return %c0_i32, %c0_i32_0 : i32, i32
  }
  func.func @transform_9(%arg0: i32) -> (i32, i32) {
    %c0_i32 = arith.constant 0 : i32
    %c0_i32_0 = arith.constant 0 : i32
    %c0_i32_1 = arith.constant 0 : i32
    return %c0_i32, %c0_i32_0 : i32, i32
  }
  func.func @transform_10(%arg0: i32) -> (i32, i32) {
    %c0_i32 = arith.constant 0 : i32
    %c0_i32_0 = arith.constant 0 : i32
    %c0_i32_1 = arith.constant 0 : i32
    return %c0_i32, %c0_i32_0 : i32, i32
  }
  func.func @transform_11(%arg0: i32) -> (i32, i32) {
    %c0_i32 = arith.constant 0 : i32
    %c0_i32_0 = arith.constant 0 : i32
    return %c0_i32, %arg0 : i32, i32
  }
}

</mosaic_0001>

<bundles_post_ra>
// kernel: tpu_custom_call.1
= control target key start
LH: loop header
LB: loop body
LE: loop exit
PB: predicated region body
PF: predicated region fallthrough
CT: control target
= control target key end

     0   :  { %vm76_vm0 = vcmask 130048   ;;  %s2518_s0 = inlined_call_operand.vmem [shape: f32[128,16], index: 0, kind: input, shape index: {}]   ;;  %s2519_s1 = inlined_call_operand.vmem [shape: bf16[16,16], index: 1, kind: input, shape index: {}]   ;;  %s2520_s2 = inlined_call_operand.vmem [shape: f32[1,16], index: 2, kind: input, shape index: {}]   ;;  %s2521_s3 = inlined_call_operand.vmem [shape: f32[1,16], index: 3, kind: input, shape index: {}]   ;;  %s2522_s4 = inlined_call_operand.vmem [shape: f32[1,16], index: 4, kind: input, shape index: {}]   ;;  %s2523_s5 = inlined_call_operand.vmem [shape: bf16[16,16], index: 5, kind: input, shape index: {}]   ;;  %s2524_s6 = inlined_call_operand.vmem [shape: f32[1,16], index: 6, kind: input, shape index: {}]   ;;  %s2525_s7 = inlined_call_operand.vmem [shape: f32[1,16], index: 7, kind: input, shape index: {}]   ;;  %s2526_s8 = inlined_call_operand.vmem [shape: f32[1,16], index: 8, kind: input, shape index: {}]   ;;  %s2527_s9 = inlined_call_operand.vmem [shape: bf16[16,4], index: 9, kind: input, shape index: {}]   ;;  %s2528_s10 = inlined_call_operand.vmem [shape: f32[4,1], index: 10, kind: input, shape index: {}]   ;;  %s2529_s11 = inlined_call_operand.hbm [shape: f32[4,128], index: 11, kind: output, shape index: {}]  }
   0x1   :  { %v1286_v0 = vld [vmem:[%s2519_s1] sm:$0xff]  ;;  %v41_v2 = vld [vmem:[%s2518_s0 + $0x8] sm:$0xff] }
   0x2   :  { %v40_v1 = vld [vmem:[%s2518_s0] sm:$0xff]  ;;  %v53_v5 = vld [vmem:[%s2518_s0 + $0x68] sm:$0xff]  ;;  %108 = vmatpush.bf16.msra.mxu0 %v1286_v0  ;;  %1289 = vmatpush.bf16.msra.mxu3 %v1286_v0 }
   0x3   :  { %v56_v3 = vpack.c.bf16 %v41_v2, %v40_v1  ;;  %v52_v4 = vld [vmem:[%s2518_s0 + $0x60] sm:$0xff] }
   0x4   :  { %v62_v6 = vpack.c.bf16 %v53_v5, %v52_v4 }
   0x5   :  { %1261 = vmatmul.msk.bf16.vlgmr.msra.gmra.mxu0 %vm76_vm0, %v56_v3 }
   0x6   :  { %1267 = vmatmul.msk.bf16.vlgmr.msra.gmra.mxu3 %vm76_vm0, %v62_v6 }
   0x7   :  { %16 = vsyncpa [#allocation3], 0  ;;  %v42_v7 = vld [vmem:[%s2518_s0 + $0x10] sm:$0xff]  ;;  %v43_v8 = vld [vmem:[%s2518_s0 + $0x18] sm:$0xff]  ;;  %s1396_s20 = smov [#allocation2]   ;;  %s1248_s24 = sshll.u32 %s2529_s11, 4  ;;  %s1249_s24 = int_to_ptr.hbm [resolvable:$true] %s1248_s24 }
   0x8   :  { %v54_v9 = vld [vmem:[%s2518_s0 + $0x70] sm:$0xff]  ;;  %v55_v10 = vld [vmem:[%s2518_s0 + $0x78] sm:$0xff]  ;;  %v57_v11 = vpack.c.bf16 %v43_v8, %v42_v7  ;;  %v44_v13 = vld [vmem:[%s2518_s0 + $0x20] sm:$0xff]  ;;  %s1246_s21 = sshll.u32 %s1396_s20, 4  ;;  %s1247_s21 = int_to_ptr.vmem [resolvable:$true] %s1246_s21 }
   0x9   :  { %v63_v12 = vpack.c.bf16 %v55_v10, %v54_v9  ;;  %v45_v14 = vld [vmem:[%s2518_s0 + $0x28] sm:$0xff]  ;;  %v46_v16 = vld [vmem:[%s2518_s0 + $0x30] sm:$0xff]  ;;  %v47_v17 = vld [vmem:[%s2518_s0 + $0x38] sm:$0xff] }
   0xa   :  { %v58_v15 = vpack.c.bf16 %v45_v14, %v44_v13  ;;  %v59_v18 = vpack.c.bf16 %v47_v17, %v46_v16  ;;  %v48_v19 = vld [vmem:[%s2518_s0 + $0x40] sm:$0xff]  ;;  %v49_v20 = vld [vmem:[%s2518_s0 + $0x48] sm:$0xff]  ;;  %v50_v22 = vld [vmem:[%s2518_s0 + $0x50] sm:$0xff] }
   0xb   :  { %v60_v21 = vpack.c.bf16 %v49_v20, %v48_v19  ;;  %v51_v23 = vld [vmem:[%s2518_s0 + $0x58] sm:$0xff]  ;;  %v1519_v25 = vld [vmem:[%s2520_s2] ss:$0 sm:$0xff] }
   0xc   :  { %v61_v24 = vpack.c.bf16 %v51_v23, %v50_v22 }
  0x15   :  { %1262 = vmatmul.msk.bf16.gmra.mxu0 %vm76_vm0, %v57_v11 }
  0x16   :  { %1268 = vmatmul.msk.bf16.gmra.mxu3 %vm76_vm0, %v63_v12 }
  0x25   :  { %1263 = vmatmul.msk.bf16.gmra.mxu0 %vm76_vm0, %v58_v15 }
  0x35   :  { %1264 = vmatmul.msk.bf16.gmra.mxu0 %vm76_vm0, %v59_v18 }
  0x45   :  { %1265 = vmatmul.msk.bf16.gmra.mxu0 %vm76_vm0, %v60_v21 }
  0x55   :  { %1266 = vmatmul.msk.bf16.gmra.mxu0 %vm76_vm0, %v61_v24 }
  0x82   :  { %v110_v26 = vpop.f32.mrf.mxu0 }
  0x83   :  { %v1522_v27 = vadd.f32 %v1519_v25, %v110_v26 }
  0x85   :  { %v152_v28 = vsel %vm76_vm0, %v1522_v27, 0.0  ;;  %v223_v29 = vmul.f32 %v1522_v27, %v1522_v27 }
  0x86   :  { %153 = vadd.xlane.f32.xlu0 %v152_v28 }
  0x87   :  { %v239_v30 = vsel %vm76_vm0, %v223_v29, 0.0 }
  0x88   :  { %240 = vadd.xlane.f32.xlu1 %v239_v30 }
  0x89   :  { %v140_v33 = vpop.f32.mrf.mxu3 }
  0x8a   :  { %v112_v31 = vpop.f32.mrf.mxu0  ;;  %v1538_v37 = vadd.f32 %v1519_v25, %v140_v33 }
  0x8b   :  { %v1530_v32 = vadd.f32 %v1519_v25, %v112_v31 }
  0x8c   :  { %v188_v40 = vsel %vm76_vm0, %v1538_v37, 0.0  ;;  %v235_v50 = vmul.f32 %v1538_v37, %v1538_v37 }
  0x8d   :  { %v155_v34 = vsel %vm76_vm0, %v1530_v32, 0.0  ;;  %v224_v35 = vmul.f32 %v1530_v32, %v1530_v32 }
  0x8e   :  { %156 = vadd.xlane.f32.xlu0 %v155_v34  ;;  %v275_v53 = vsel %vm76_vm0, %v235_v50, 0.0 }
  0x8f   :  { %v242_v36 = vsel %vm76_vm0, %v224_v35, 0.0 }
  0x90   :  { %243 = vadd.xlane.f32.xlu1 %v242_v36 }
  0x91   :  { %v142_v49 = vpop.f32.mrf.mxu3 }
  0x92   :  { %v115_v38 = vpop.f32.mrf.mxu0  ;;  %v1561_v52 = vadd.f32 %v1519_v25, %v142_v49 }
  0x93   :  { %v1541_v39 = vadd.f32 %v1519_v25, %v115_v38 }
  0x94   :  { %v191_v55 = vsel %vm76_vm0, %v1561_v52, 0.0  ;;  %v236_v63 = vmul.f32 %v1561_v52, %v1561_v52 }
  0x95   :  { %v158_v41 = vsel %vm76_vm0, %v1541_v39, 0.0  ;;  %v225_v42 = vmul.f32 %v1541_v39, %v1541_v39 }
  0x96   :  { %159 = vadd.xlane.f32.xlu2 %v158_v41  ;;  %189 = vadd.xlane.f32.xlu0 %v188_v40  ;;  %v278_v4 = vsel %vm76_vm0, %v236_v63, 0.0 }
  0x97   :  { %v245_v46 = vsel %vm76_vm0, %v225_v42, 0.0 }
  0x99   :  { %v145_v2 = vpop.f32.mrf.mxu3 }
  0x9a   :  { %v117_v43 = vpop.f32.mrf.mxu0  ;;  %v1601_v13 = vadd.f32 %v1519_v25, %v145_v2 }
  0x9b   :  { %v1550_v44 = vadd.f32 %v1519_v25, %v117_v43 }
  0x9c   :  { %v237_v17 = vmul.f32 %v1601_v13, %v1601_v13  ;;  %v194_v18 = vsel %vm76_vm0, %v1601_v13, 0.0 }
  0x9d   :  { %v161_v45 = vsel %vm76_vm0, %v1550_v44, 0.0  ;;  %v226_v47 = vmul.f32 %v1550_v44, %v1550_v44 }
  0x9e   :  { %162 = vadd.xlane.f32.xlu2 %v161_v45  ;;  %246 = vadd.xlane.f32.xlu0 %v245_v46  ;;  %v281_v20 = vsel %vm76_vm0, %v237_v17, 0.0 }
  0x9f   :  { %v248_v48 = vsel %vm76_vm0, %v226_v47, 0.0  ;;  %v1394_v47 = vmov 16.0  }
  0xa0   :  { %249 = vadd.xlane.f32.xlu1 %v248_v48  ;;  %1302 = vrcp.f32 %v1394_v47 }
  0xa1   :  { %v147_v12 = vpop.f32.mrf.mxu3 }
  0xa2   :  { %v120_v51 = vpop.f32.mrf.mxu0  ;;  %v1605_v15 = vadd.f32 %v1519_v25, %v147_v12 }
  0xa3   :  { %v1565_v54 = vadd.f32 %v1519_v25, %v120_v51 }
  0xa4   :  { %v197_v19 = vsel %vm76_vm0, %v1605_v15, 0.0  ;;  %v238_v22 = vmul.f32 %v1605_v15, %v1605_v15 }
  0xa5   :  { %v227_v58 = vmul.f32 %v1565_v54, %v1565_v54  ;;  %v164_v59 = vsel %vm76_vm0, %v1565_v54, 0.0 }
  0xa6   :  { %276 = vadd.xlane.f32.xlu2 %v275_v53  ;;  %v284_v26 = vsel %vm76_vm0, %v238_v22, 0.0  ;;  %v1303_v49 = vpop.eup %1302 }
  0xa7   :  { %v251_v61 = vsel %vm76_vm0, %v227_v58, 0.0  ;;  %v201_v50 = vmul.f32 16.0, %v1303_v49  ;;  %vm205_vm1 = vweird.f32 %v1303_v49 }
  0xa8   :  { %192 = vadd.xlane.f32.xlu1 %v191_v55 }
  0xa9   :  { %v202_v51 = vsub.f32 1.0, %v201_v50 }
  0xaa   :  { %v122_v56 = vpop.f32.mrf.mxu0 }
  0xab   :  { %v1570_v57 = vadd.f32 %v1519_v25, %v122_v56 }
  0xad   :  { %v167_v60 = vsel %vm76_vm0, %v1570_v57, 0.0  ;;  %v228_v62 = vmul.f32 %v1570_v57, %v1570_v57 }
  0xae   :  { %165 = vadd.xlane.f32.xlu2 %v164_v59  ;;  %168 = vadd.xlane.f32.xlu0 %v167_v60 }
  0xaf   :  { %v254_v3 = vsel %vm76_vm0, %v228_v62, 0.0 }
  0xb0   :  { %252 = vadd.xlane.f32.xlu1 %v251_v61 }
  0xb2   :  { %v125_v0 = vpop.f32.mrf.mxu0 }
  0xb3   :  { %v1584_v1 = vadd.f32 %v1519_v25, %v125_v0 }
  0xb5   :  { %v170_v5 = vsel %vm76_vm0, %v1584_v1, 0.0  ;;  %v229_v6 = vmul.f32 %v1584_v1, %v1584_v1 }
  0xb6   :  { %255 = vadd.xlane.f32.xlu2 %v254_v3  ;;  %279 = vadd.xlane.f32.xlu0 %v278_v4 }
  0xb7   :  { %v257_v10 = vsel %vm76_vm0, %v229_v6, 0.0  ;;  %v1287_v6 = vld [vmem:[%s2523_s5] sm:$0xff] }
  0xb8   :  { %171 = vadd.xlane.f32.xlu1 %v170_v5  ;;  %664 = vmatpush.bf16.msra.mxu1 %v1287_v6 }
  0xb9   :  { %1290 = vmatpush.bf16.msrb.mxu3 %v1287_v6 }
  0xba   :  { %v127_v7 = vpop.f32.mrf.mxu0 }
  0xbb   :  { %v1593_v8 = vadd.f32 %v1519_v25, %v127_v7 }
  0xbd   :  { %v173_v9 = vsel %vm76_vm0, %v1593_v8, 0.0  ;;  %v230_v11 = vmul.f32 %v1593_v8, %v1593_v8 }
  0xbe   :  { %174 = vadd.xlane.f32.xlu2 %v173_v9  ;;  %258 = vadd.xlane.f32.xlu0 %v257_v10 }
  0xbf   :  { %v260_v14 = vsel %vm76_vm0, %v230_v11, 0.0 }
  0xc0   :  { %261 = vadd.xlane.f32.xlu1 %v260_v14 }
  0xc2   :  { %v130_v16 = vpop.f32.mrf.mxu0 }
  0xc3   :  { %v1615_v21 = vadd.f32 %v1519_v25, %v130_v16 }
  0xc5   :  { %v176_v28 = vsel %vm76_vm0, %v1615_v21, 0.0  ;;  %v231_v30 = vmul.f32 %v1615_v21, %v1615_v21 }
  0xc6   :  { %195 = vadd.xlane.f32.xlu2 %v194_v18  ;;  %198 = vadd.xlane.f32.xlu0 %v197_v19 }
  0xc7   :  { %v263_v35 = vsel %vm76_vm0, %v231_v30, 0.0 }
  0xc8   :  { %282 = vadd.xlane.f32.xlu1 %v281_v20 }
  0xca   :  { %v132_v23 = vpop.f32.mrf.mxu0 }
  0xcb   :  { %v1620_v24 = vadd.f32 %v1519_v25, %v132_v23 }
  0xcd   :  { %v179_v29 = vsel %vm76_vm0, %v1620_v24, 0.0  ;;  %v232_v31 = vmul.f32 %v1620_v24, %v1620_v24 }
  0xce   :  { %285 = vadd.xlane.f32.xlu2 %v284_v26  ;;  %177 = vadd.xlane.f32.xlu0 %v176_v28 }
  0xcf   :  { %v266_v36 = vsel %vm76_vm0, %v232_v31, 0.0 }
  0xd0   :  { %180 = vadd.xlane.f32.xlu1 %v179_v29 }
  0xd2   :  { %v135_v33 = vpop.f32.mrf.mxu0 }
  0xd3   :  { %v1632_v34 = vadd.f32 %v1519_v25, %v135_v33 }
  0xd5   :  { %v182_v38 = vsel %vm76_vm0, %v1632_v34, 0.0  ;;  %v233_v40 = vmul.f32 %v1632_v34, %v1632_v34 }
  0xd6   :  { %264 = vadd.xlane.f32.xlu2 %v263_v35  ;;  %267 = vadd.xlane.f32.xlu0 %v266_v36 }
  0xd7   :  { %v269_v43 = vsel %vm76_vm0, %v233_v40, 0.0 }
  0xd8   :  { %183 = vadd.xlane.f32.xlu1 %v182_v38 }
  0xda   :  { %v137_v41 = vpop.f32.mrf.mxu0 }
  0xdb   :  { %v1641_v42 = vadd.f32 %v1519_v25, %v137_v41  ;;  %v203_v25 = vmul.f32 %v1303_v49, %v202_v51 }
  0xdd   :  { %v185_v45 = vsel %vm76_vm0, %v1641_v42, 0.0  ;;  %v234_v46 = vmul.f32 %v1641_v42, %v1641_v42  ;;  %v204_v53 = vadd.f32 %v1303_v49, %v203_v25 }
  0xde   :  { %186 = vadd.xlane.f32.xlu2 %v185_v45  ;;  %270 = vadd.xlane.f32.xlu0 %v269_v43  ;;  %v1681_v45 = vld [vmem:[%s2521_s3] ss:$0 sm:$0xff] }
  0xdf   :  { %v272_v48 = vsel %vm76_vm0, %v234_v46, 0.0  ;;  %v1649_v55 = vsel %vm205_vm1, %v1303_v49, %v204_v53 }
  0xe0   :  { %273 = vadd.xlane.f32.xlu1 %v272_v48 }
  0xf9   :  { %v154_v56 = vpop.xlane.xlu0 %153 }
  0xfa   :  { %v1652_v58 = vmul.f32 %v1649_v55, %v154_v56 }
  0xfb   :  { %v241_v59 = vpop.xlane.xlu1 %240 }
  0xfc   :  { %v303_v60 = vmul.f32 %v1652_v58, %v1652_v58  ;;  %v287_v61 = vmul.f32 %v241_v59, %v1649_v55 }
  0xfe   :  { %v319_v62 = vsub.f32 %v287_v61, %v303_v60 }
 0x100   :  { %v335_v63 = vmax.f32 %v319_v62, 0.0 }
 0x101   :  { %v157_v0 = vpop.xlane.xlu0 %156 }
 0x102   :  { %v351_v2 = vadd.f32 1e-05, %v335_v63  ;;  %v1658_v3 = vmul.f32 %v1649_v55, %v157_v0  ;;  %v527_v0 = vsub.f32 %v1522_v27, %v1652_v58 }
 0x103   :  { %v244_v4 = vpop.xlane.xlu1 %243 }
 0x104   :  { %1304 = vrsqrt.f32 %v351_v2  ;;  %v304_v5 = vmul.f32 %v1658_v3, %v1658_v3  ;;  %v288_v7 = vmul.f32 %v244_v4, %v1649_v55  ;;  %vm373_vm3 = vweird.f32 %v351_v2 }
 0x106   :  { %v320_v9 = vsub.f32 %v288_v7, %v304_v5 }
 0x108   :  { %v336_v10 = vmax.f32 %v320_v9, 0.0  ;;  %v1701_v9 = vld [vmem:[%s2522_s4] ss:$0 sm:$0xff] }
 0x109   :  { %v160_v11 = vpop.xlane.xlu2 %159  ;;  %v190_v12 = vpop.xlane.xlu0 %189 }
 0x10a   :  { %v1305_v14 = vpop.eup %1304  ;;  %v352_v17 = vadd.f32 1e-05, %v336_v10  ;;  %v1667_v20 = vmul.f32 %v1649_v55, %v160_v11  ;;  %v1684_v47 = vmul.f32 %v1649_v55, %v190_v12  ;;  %v528_v10 = vsub.f32 %v1530_v32, %v1658_v3 }
 0x10b   :  { %v368_v16 = vmul.f32 %v1305_v14, %v351_v2  ;;  %vm374_vm2 = vweird.f32 %v1305_v14 }
 0x10c   :  { %1306 = vrsqrt.f32 %v352_v17  ;;  %v305_v33 = vmul.f32 %v1667_v20, %v1667_v20  ;;  %vm375_vm4 = vmor %vm373_vm3, %vm374_vm2  ;;  %v315_v51 = vmul.f32 %v1684_v47, %v1684_v47  ;;  %vm383_vm6 = vweird.f32 %v352_v17 }
 0x10d   :  { %v369_v18 = vmul.f32 %v1305_v14, %v368_v16 }
 0x10f   :  { %v370_v19 = vmul.f32 0.5, %v369_v18 }
 0x111   :  { %v371_v22 = vsub.f32 1.5, %v370_v19  ;;  %v163_v23 = vpop.xlane.xlu2 %162  ;;  %v247_v26 = vpop.xlane.xlu0 %246 }
 0x112   :  { %v1670_v28 = vmul.f32 %v1649_v55, %v163_v23  ;;  %v289_v29 = vmul.f32 %v247_v26, %v1649_v55  ;;  %v1307_v30 = vpop.eup %1306 }
 0x113   :  { %v372_v31 = vmul.f32 %v1305_v14, %v371_v22  ;;  %v250_v35 = vpop.xlane.xlu1 %249  ;;  %v378_v36 = vmul.f32 %v1307_v30, %v352_v17  ;;  %vm384_vm5 = vweird.f32 %v1307_v30 }
 0x114   :  { %v306_v38 = vmul.f32 %v1670_v28, %v1670_v28  ;;  %v321_v40 = vsub.f32 %v289_v29, %v305_v33  ;;  %v290_v41 = vmul.f32 %v250_v35, %v1649_v55  ;;  %vm385_vm7 = vmor %vm383_vm6, %vm384_vm5 }
 0x115   :  { %v379_v43 = vmul.f32 %v1307_v30, %v378_v36  ;;  %v376_v46 = vsel %vm375_vm4, %v1305_v14, %v372_v31 }
 0x116   :  { %v337_v48 = vmax.f32 %v321_v40, 0.0  ;;  %v322_v49 = vsub.f32 %v290_v41, %v306_v38  ;;  %v546_v61 = vmul.f32 %v1681_v45, %v376_v46 }
 0x117   :  { %v380_v50 = vmul.f32 0.5, %v379_v43 }
 0x118   :  { %v1688_v25 = vadd.f32 1e-05, %v337_v48  ;;  %v338_v53 = vmax.f32 %v322_v49, 0.0  ;;  %v562_v7 = vmul.f32 %v546_v61, %v527_v0 }
 0x119   :  { %v277_v56 = vpop.xlane.xlu2 %276  ;;  %v381_v59 = vsub.f32 1.5, %v380_v50 }
 0x11a   :  { %v299_v60 = vmul.f32 %v277_v56, %v1649_v55  ;;  %1308 = vrsqrt.f32 %v1688_v25  ;;  %v1693_v62 = vadd.f32 1e-05, %v338_v53  ;;  %v581_v18 = vadd.f32 %v1701_v9, %v562_v7 }
 0x11b   :  { %v193_v63 = vpop.xlane.xlu1 %192  ;;  %v382_v2 = vmul.f32 %v1307_v30, %v381_v59  ;;  %vm393_vm8 = vweird.f32 %v1688_v25 }
 0x11c   :  { %v331_v4 = vsub.f32 %v299_v60, %v315_v51  ;;  %1310 = vrsqrt.f32 %v1693_v62  ;;  %v1712_v22 = vmul.f32 %v1649_v55, %v193_v63  ;;  %v597_v38 = vmax.f32 %v581_v18, 0.0 }
 0x11d   :  { %v386_v5 = vsel %vm385_vm7, %v1307_v30, %v382_v2  ;;  %vm403_vm12 = vweird.f32 %v1693_v62 }
 0x11e   :  { %v347_v6 = vmax.f32 %v331_v4, 0.0  ;;  %v547_v11 = vmul.f32 %v1681_v45, %v386_v5  ;;  %v316_v41 = vmul.f32 %v1712_v22, %v1712_v22 }
 0x120   :  { %v1706_v27 = vadd.f32 1e-05, %v347_v6  ;;  %v1309_v58 = vpop.eup %1308  ;;  %v563_v16 = vmul.f32 %v547_v11, %v528_v10 }
 0x121   :  { %v166_v12 = vpop.xlane.xlu2 %165  ;;  %v169_v14 = vpop.xlane.xlu0 %168  ;;  %v388_v17 = vmul.f32 %v1309_v58, %v1688_v25  ;;  %vm394_vm9 = vweird.f32 %v1309_v58  ;;  %v529_v25 = vsub.f32 %v1541_v39, %v1667_v20 }
 0x122   :  { %1312 = vrsqrt.f32 %v1706_v27  ;;  %v1311_v19 = vpop.eup %1310  ;;  %v1715_v32 = vmul.f32 %v1649_v55, %v166_v12  ;;  %v582_v23 = vadd.f32 %v1701_v9, %v563_v16  ;;  %v1723_v33 = vmul.f32 %v1649_v55, %v169_v14  ;;  %vm1739_vm11 = vmor %vm393_vm8, %vm394_vm9 }
 0x123   :  { %v253_v3 = vpop.xlane.xlu1 %252  ;;  %v389_v26 = vmul.f32 %v1309_v58, %v388_v17  ;;  %v398_v29 = vmul.f32 %v1311_v19, %v1693_v62  ;;  %vm404_vm10 = vweird.f32 %v1311_v19  ;;  %vm493_vm15 = vweird.f32 %v1706_v27 }
 0x124   :  { %v291_v30 = vmul.f32 %v253_v3, %v1649_v55  ;;  %v307_v31 = vmul.f32 %v1715_v32, %v1715_v32  ;;  %v598_v40 = vmax.f32 %v582_v23, 0.0  ;;  %v308_v53 = vmul.f32 %v1723_v33, %v1723_v33  ;;  %vm405_vm13 = vmor %vm403_vm12, %vm404_vm10 }
 0x125   :  { %v390_v35 = vmul.f32 0.5, %v389_v26  ;;  %v399_v36 = vmul.f32 %v1311_v19, %v398_v29  ;;  %v530_v23 = vsub.f32 %v1550_v44, %v1670_v28 }
 0x126   :  { %v323_v43 = vsub.f32 %v291_v30, %v307_v31  ;;  %v613_v50 = vpack.c.bf16 %v598_v40, %v597_v38 }
 0x127   :  { %v391_v48 = vsub.f32 1.5, %v390_v35  ;;  %v400_v49 = vmul.f32 0.5, %v399_v36 }
 0x128   :  { %v1728_v46 = vpop.eup %1312  ;;  %v339_v56 = vmax.f32 %v323_v43, 0.0  ;;  %1273 = vmatmul.msk.bf16.vlgmr.msra.gmra.mxu1 %vm76_vm0, %v613_v50 }
 0x129   :  { %v488_v51 = vmul.f32 %v1728_v46, %v1706_v27  ;;  %v256_v59 = vpop.xlane.xlu2 %255  ;;  %v280_v60 = vpop.xlane.xlu0 %279  ;;  %v392_v61 = vmul.f32 %v1309_v58, %v391_v48  ;;  %v401_v63 = vsub.f32 1.5, %v400_v49  ;;  %vm494_vm14 = vweird.f32 %v1728_v46 }
 0x12a   :  { %v292_v0 = vmul.f32 %v256_v59, %v1649_v55  ;;  %v300_v2 = vmul.f32 %v280_v60, %v1649_v55  ;;  %v1745_v6 = vadd.f32 1e-05, %v339_v56  ;;  %vm1783_vm1 = vmor %vm493_vm15, %vm494_vm14 }
 0x12b   :  { %v489_v5 = vmul.f32 %v1728_v46, %v488_v51  ;;  %v172_v7 = vpop.xlane.xlu1 %171  ;;  %v396_v10 = vsel %vm1739_vm11, %v1309_v58, %v392_v61  ;;  %v402_v11 = vmul.f32 %v1311_v19, %v401_v63 }
 0x12c   :  { %v324_v12 = vsub.f32 %v292_v0, %v308_v53  ;;  %v332_v14 = vsub.f32 %v300_v2, %v316_v41  ;;  %1314 = vrsqrt.f32 %v1745_v6  ;;  %v548_v3 = vmul.f32 %v1681_v45, %v396_v10 }
 0x12d   :  { %v490_v16 = vmul.f32 0.5, %v489_v5  ;;  %v406_v62 = vsel %vm405_vm13, %v1311_v19, %v402_v11  ;;  %v1757_v58 = vmul.f32 %v1649_v55, %v172_v7  ;;  %vm413_vm3 = vweird.f32 %v1745_v6 }
 0x12e   :  { %v340_v17 = vmax.f32 %v324_v12, 0.0  ;;  %v348_v18 = vmax.f32 %v332_v14, 0.0  ;;  %v549_v26 = vmul.f32 %v1681_v45, %v406_v62  ;;  %v564_v20 = vmul.f32 %v548_v3, %v529_v25 }
 0x12f   :  { %v491_v30 = vsub.f32 1.5, %v490_v16  ;;  %v309_v28 = vmul.f32 %v1757_v58, %v1757_v58 }
 0x130   :  { %v1760_v29 = vadd.f32 1e-05, %v340_v17  ;;  %v1762_v39 = vadd.f32 1e-05, %v348_v18  ;;  %v565_v35 = vmul.f32 %v549_v26, %v530_v23  ;;  %v583_v48 = vadd.f32 %v1701_v9, %v564_v20 }
 0x131   :  { %v175_v31 = vpop.xlane.xlu2 %174  ;;  %v259_v19 = vpop.xlane.xlu0 %258  ;;  %v492_v49 = vmul.f32 %v1728_v46, %v491_v30  ;;  %v539_v17 = vsub.f32 %v1538_v37, %v1684_v47 }
 0x132   :  { %1316 = vrsqrt.f32 %v1760_v29  ;;  %v1766_v36 = vmul.f32 %v1649_v55, %v175_v31  ;;  %v1315_v44 = vpop.eup %1314  ;;  %v293_v38 = vmul.f32 %v259_v19, %v1649_v55  ;;  %v584_v53 = vadd.f32 %v1701_v9, %v565_v35 }
 0x133   :  { %1318 = vrsqrt.f32 %v1762_v39  ;;  %v262_v40 = vpop.xlane.xlu1 %261  ;;  %v408_v41 = vmul.f32 %v1315_v44, %v1745_v6  ;;  %v599_v4 = vmax.f32 %v583_v48, 0.0  ;;  %v496_v7 = vsel %vm1783_vm1, %v1728_v46, %v492_v49 }
 0x134   :  { %v310_v43 = vmul.f32 %v1766_v36, %v1766_v36  ;;  %v325_v50 = vsub.f32 %v293_v38, %v309_v28  ;;  %v294_v51 = vmul.f32 %v262_v40, %v1649_v55  ;;  %v600_v61 = vmax.f32 %v584_v53, 0.0 }
 0x135   :  { %v409_v56 = vmul.f32 %v1315_v44, %v408_v41  ;;  %vm414_vm2 = vweird.f32 %v1315_v44  ;;  %v558_v30 = vmul.f32 %v1681_v45, %v496_v7  ;;  %v540_v31 = vsub.f32 %v1561_v52, %v1712_v22 }
 0x136   :  { %v341_v59 = vmax.f32 %v325_v50, 0.0  ;;  %v326_v60 = vsub.f32 %v294_v51, %v310_v43  ;;  %v614_v62 = vpack.c.bf16 %v600_v61, %v599_v4  ;;  %vm415_vm4 = vmor %vm413_vm3, %vm414_vm2  ;;  %v531_v41 = vsub.f32 %v1565_v54, %v1715_v32 }
 0x137   :  { %v410_v2 = vmul.f32 0.5, %v409_v56  ;;  %v532_v22 = vsub.f32 %v1570_v57, %v1723_v33  ;;  %vm423_vm7 = vweird.f32 %v1760_v29  ;;  %v574_v51 = vmul.f32 %v558_v30, %v539_v17 }
 0x138   :  { %v1781_v63 = vpop.eup %1316  ;;  %v1792_v27 = vadd.f32 1e-05, %v341_v59  ;;  %v342_v11 = vmax.f32 %v326_v60, 0.0  ;;  %1274 = vmatmul.msk.bf16.gmra.mxu1 %vm76_vm0, %v614_v62  ;;  %vm503_vm9 = vweird.f32 %v1762_v39 }
 0x139   :  { %v1319_v5 = vpop.eup %1318  ;;  %v418_v10 = vmul.f32 %v1781_v63, %v1760_v29  ;;  %v196_v12 = vpop.xlane.xlu2 %195  ;;  %v411_v25 = vsub.f32 1.5, %v410_v2  ;;  %vm424_vm5 = vweird.f32 %v1781_v63 }
 0x13a   :  { %v199_v14 = vpop.xlane.xlu0 %198  ;;  %v498_v16 = vmul.f32 %v1319_v5, %v1762_v39  ;;  %1320 = vrsqrt.f32 %v1792_v27  ;;  %v1799_v46 = vadd.f32 1e-05, %v342_v11  ;;  %v1804_v20 = vmul.f32 %v1649_v55, %v196_v12  ;;  %vm1826_vm8 = vmor %vm423_vm7, %vm424_vm5 }
 0x13b   :  { %v419_v18 = vmul.f32 %v1781_v63, %v418_v10  ;;  %v283_v3 = vpop.xlane.xlu1 %282  ;;  %v412_v23 = vmul.f32 %v1315_v44, %v411_v25  ;;  %v1815_v38 = vmul.f32 %v1649_v55, %v199_v14  ;;  %vm504_vm6 = vweird.f32 %v1319_v5 }
 0x13c   :  { %v499_v26 = vmul.f32 %v1319_v5, %v498_v16  ;;  %1322 = vrsqrt.f32 %v1799_v46  ;;  %v301_v47 = vmul.f32 %v283_v3, %v1649_v55  ;;  %v317_v6 = vmul.f32 %v1804_v20, %v1804_v20  ;;  %vm505_vm10 = vmor %vm503_vm9, %vm504_vm6 }
 0x13d   :  { %v420_v37 = vmul.f32 0.5, %v419_v18  ;;  %v416_v19 = vsel %vm415_vm4, %v1315_v44, %v412_v23  ;;  %v318_v33 = vmul.f32 %v1815_v38, %v1815_v38  ;;  %v593_v11 = vadd.f32 %v1701_v9, %v574_v51 }
 0x13e   :  { %v500_v35 = vmul.f32 0.5, %v499_v26  ;;  %v550_v40 = vmul.f32 %v1681_v45, %v416_v19  ;;  %v333_v48 = vsub.f32 %v301_v47, %v317_v6  ;;  %vm433_vm13 = vweird.f32 %v1792_v27 }
 0x13f   :  { %v421_v28 = vsub.f32 1.5, %v420_v37  ;;  %vm443_vm15 = vweird.f32 %v1799_v46 }
 0x140   :  { %v501_v43 = vsub.f32 1.5, %v500_v35  ;;  %v1820_v52 = vpop.eup %1320  ;;  %v349_v56 = vmax.f32 %v333_v48, 0.0  ;;  %v566_v61 = vmul.f32 %v550_v40, %v531_v41 }
 0x141   :  { %v422_v44 = vmul.f32 %v1781_v63, %v421_v28  ;;  %v286_v49 = vpop.xlane.xlu2 %285  ;;  %v428_v32 = vmul.f32 %v1820_v52, %v1792_v27  ;;  %vm434_vm11 = vweird.f32 %v1820_v52 }
 0x142   :  { %v178_v50 = vpop.xlane.xlu0 %177  ;;  %v502_v54 = vmul.f32 %v1319_v5, %v501_v43  ;;  %v1833_v59 = vpop.eup %1322  ;;  %v302_v29 = vmul.f32 %v286_v49, %v1649_v55  ;;  %v1849_v7 = vadd.f32 1e-05, %v349_v56  ;;  %v585_v62 = vadd.f32 %v1701_v9, %v566_v61  ;;  %vm1876_vm14 = vmor %vm433_vm13, %vm434_vm11 }
 0x143   :  { %v426_v57 = vsel %vm1826_vm8, %v1781_v63, %v422_v44  ;;  %v181_v60 = vpop.xlane.xlu1 %180  ;;  %v429_v0 = vmul.f32 %v1820_v52, %v428_v32  ;;  %v438_v2 = vmul.f32 %v1833_v59, %v1799_v46  ;;  %v1846_v4 = vmul.f32 %v1649_v55, %v178_v50 }
 0x144   :  { %v506_v39 = vsel %vm505_vm10, %v1319_v5, %v502_v54  ;;  %v334_v10 = vsub.f32 %v302_v29, %v318_v33  ;;  %v1855_v14 = vmul.f32 %v1649_v55, %v181_v60  ;;  %1324 = vrsqrt.f32 %v1849_v7 }
 0x145   :  { %v559_v63 = vmul.f32 %v1681_v45, %v506_v39  ;;  %v430_v12 = vmul.f32 0.5, %v429_v0  ;;  %v439_v5 = vmul.f32 %v1833_v59, %v438_v2  ;;  %v551_v16 = vmul.f32 %v1681_v45, %v426_v57 }
 0x146   :  { %v350_v25 = vmax.f32 %v334_v10, 0.0  ;;  %vm444_vm12 = vweird.f32 %v1833_v59  ;;  %v311_v3 = vmul.f32 %v1846_v4, %v1846_v4  ;;  %v312_v26 = vmul.f32 %v1855_v14, %v1855_v14 }
 0x147   :  { %v431_v17 = vsub.f32 1.5, %v430_v12  ;;  %v440_v18 = vmul.f32 0.5, %v439_v5  ;;  %v567_v47 = vmul.f32 %v551_v16, %v532_v22  ;;  %v575_v19 = vmul.f32 %v559_v63, %v540_v31  ;;  %vm1886_vm1 = vmor %vm443_vm15, %vm444_vm12 }
 0x148   :  { %v1863_v23 = vadd.f32 1e-05, %v350_v25  ;;  %v601_v51 = vmax.f32 %v585_v62, 0.0  ;;  %v609_v54 = vmax.f32 %v593_v11, 0.0  ;;  %vm513_vm3 = vweird.f32 %v1849_v7 }
 0x149   :  { %v265_v30 = vpop.xlane.xlu2 %264  ;;  %v432_v35 = vmul.f32 %v1820_v52, %v431_v17  ;;  %v441_v6 = vsub.f32 1.5, %v440_v18  ;;  %v586_v43 = vadd.f32 %v1701_v9, %v567_v47  ;;  %v594_v48 = vadd.f32 %v1701_v9, %v575_v19 }
 0x14a   :  { %v268_v37 = vpop.xlane.xlu0 %267  ;;  %v295_v28 = vmul.f32 %v265_v30, %v1649_v55  ;;  %1326 = vrsqrt.f32 %v1863_v23  ;;  %v1882_v27 = vpop.eup %1324  ;;  %vm523_vm6 = vweird.f32 %v1863_v23 }
 0x14b   :  { %v296_v40 = vmul.f32 %v268_v37, %v1649_v55  ;;  %v184_v41 = vpop.xlane.xlu1 %183  ;;  %v442_v22 = vmul.f32 %v1833_v59, %v441_v6  ;;  %v602_v53 = vmax.f32 %v586_v43, 0.0  ;;  %v610_v32 = vmax.f32 %v594_v48, 0.0 }
 0x14c   :  { %v327_v44 = vsub.f32 %v295_v28, %v311_v3  ;;  %v436_v56 = vsel %vm1876_vm14, %v1820_v52, %v432_v35  ;;  %v508_v57 = vmul.f32 %v1882_v27, %v1849_v7  ;;  %v1902_v0 = vmul.f32 %v1649_v55, %v184_v41 }
 0x14d   :  { %v328_v49 = vsub.f32 %v296_v40, %v312_v26  ;;  %v446_v46 = vsel %vm1886_vm1, %v1833_v59, %v442_v22  ;;  %v615_v60 = vpack.c.bf16 %v602_v53, %v601_v51  ;;  %v619_v2 = vpack.c.bf16 %v610_v32, %v609_v54 }
 0x14e   :  { %v343_v33 = vmax.f32 %v327_v44, 0.0  ;;  %v509_v61 = vmul.f32 %v1882_v27, %v508_v57  ;;  %v533_v52 = vsub.f32 %v1584_v1, %v1757_v58  ;;  %v552_v12 = vmul.f32 %v1681_v45, %v436_v56 }
 0x14f   :  { %v344_v29 = vmax.f32 %v328_v49, 0.0  ;;  %1275 = vmatmul.msk.bf16.gmra.mxu1 %vm76_vm0, %v615_v60  ;;  %v553_v5 = vmul.f32 %v1681_v45, %v446_v46  ;;  %v313_v62 = vmul.f32 %v1902_v0, %v1902_v0  ;;  %1279 = vmatmul.msk.bf16.vlgmr.msrb.gmra.mxu3 %vm76_vm0, %v619_v2  ;;  %v534_v1 = vsub.f32 %v1593_v8, %v1766_v36 }
 0x150   :  { %v1899_v39 = vadd.f32 1e-05, %v343_v33  ;;  %v1327_v63 = vpop.eup %1326  ;;  %v510_v25 = vmul.f32 0.5, %v509_v61  ;;  %vm514_vm2 = vweird.f32 %v1882_v27  ;;  %v568_v47 = vmul.f32 %v552_v12, %v533_v52 }
 0x151   :  { %v1906_v10 = vadd.f32 1e-05, %v344_v29  ;;  %v187_v59 = vpop.xlane.xlu2 %186  ;;  %v518_v16 = vmul.f32 %v1327_v63, %v1863_v23  ;;  %v569_v19 = vmul.f32 %v553_v5, %v534_v1  ;;  %vm1931_vm4 = vmor %vm513_vm3, %vm514_vm2  ;;  %vm524_vm5 = vweird.f32 %v1327_v63 }
 0x152   :  { %v271_v11 = vpop.xlane.xlu0 %270  ;;  %1328 = vrsqrt.f32 %v1899_v39  ;;  %v1921_v58 = vmul.f32 %v1649_v55, %v187_v59  ;;  %v511_v18 = vsub.f32 1.5, %v510_v25  ;;  %v541_v22 = vsub.f32 %v1601_v13, %v1804_v20  ;;  %vm525_vm7 = vmor %vm523_vm6, %vm524_vm5 }
 0x153   :  { %1330 = vrsqrt.f32 %v1906_v10  ;;  %v274_v17 = vpop.xlane.xlu1 %273  ;;  %v519_v3 = vmul.f32 %v1327_v63, %v518_v16  ;;  %v297_v26 = vmul.f32 %v271_v11, %v1649_v55  ;;  %v588_v40 = vadd.f32 %v1701_v9, %v569_v19 }
 0x154   :  { %v298_v30 = vmul.f32 %v274_v17, %v1649_v55  ;;  %v314_v37 = vmul.f32 %v1921_v58, %v1921_v58  ;;  %v512_v8 = vmul.f32 %v1882_v27, %v511_v18  ;;  %v587_v50 = vadd.f32 %v1701_v9, %v568_v47 }
 0x155   :  { %v520_v36 = vmul.f32 0.5, %v519_v3  ;;  %v329_v35 = vsub.f32 %v297_v26, %v313_v62  ;;  %v604_v56 = vmax.f32 %v588_v40, 0.0  ;;  %v542_v13 = vsub.f32 %v1605_v15, %v1815_v38 }
 0x156   :  { %v330_v28 = vsub.f32 %v298_v30, %v314_v37  ;;  %v516_v43 = vsel %vm1931_vm4, %v1882_v27, %v512_v8  ;;  %v603_v29 = vmax.f32 %v587_v50, 0.0  ;;  %vm453_vm10 = vweird.f32 %v1899_v39 }
 0x157   :  { %v521_v48 = vsub.f32 1.5, %v520_v36  ;;  %v345_v31 = vmax.f32 %v329_v35, 0.0  ;;  %v560_v46 = vmul.f32 %v1681_v45, %v516_v43  ;;  %vm463_vm12 = vweird.f32 %v1906_v10 }
 0x158   :  { %v1329_v41 = vpop.eup %1328  ;;  %v346_v49 = vmax.f32 %v330_v28, 0.0  ;;  %v616_v52 = vpack.c.bf16 %v604_v56, %v603_v29  ;;  %v535_v18 = vsub.f32 %v1615_v21, %v1846_v4  ;;  %v536_v30 = vsub.f32 %v1620_v24, %v1855_v14 }
 0x159   :  { %v1331_v7 = vpop.eup %1330  ;;  %v448_v44 = vmul.f32 %v1329_v41, %v1899_v39  ;;  %v522_v51 = vmul.f32 %v1327_v63, %v521_v48  ;;  %v361_v54 = vadd.f32 1e-05, %v345_v31  ;;  %v576_v61 = vmul.f32 %v560_v46, %v541_v22 }
 0x15a   :  { %v458_v53 = vmul.f32 %v1331_v7, %v1906_v10  ;;  %v362_v32 = vadd.f32 1e-05, %v346_v49  ;;  %vm454_vm8 = vweird.f32 %v1329_v41  ;;  %vm464_vm9 = vweird.f32 %v1331_v7 }
 0x15b   :  { %v449_v27 = vmul.f32 %v1329_v41, %v448_v44  ;;  %v526_v20 = vsel %vm525_vm7, %v1327_v63, %v522_v51  ;;  %1332 = vrsqrt.f32 %v361_v54  ;;  %v595_v12 = vadd.f32 %v1701_v9, %v576_v61  ;;  %vm455_vm11 = vmor %vm453_vm10, %vm454_vm8 }
 0x15c   :  { %v459_v57 = vmul.f32 %v1331_v7, %v458_v53  ;;  %1334 = vrsqrt.f32 %v362_v32  ;;  %v561_v23 = vmul.f32 %v1681_v45, %v526_v20  ;;  %vm465_vm13 = vmor %vm463_vm12, %vm464_vm9  ;;  %vm473_vm1 = vweird.f32 %v361_v54 }
 0x15d   :  { %v450_v33 = vmul.f32 0.5, %v449_v27  ;;  %v611_v1 = vmax.f32 %v595_v12, 0.0  ;;  %vm483_vm3 = vweird.f32 %v362_v32  ;;  %v538_v44 = vsub.f32 %v1641_v42, %v1921_v58 }
 0x15e   :  { %v460_v60 = vmul.f32 0.5, %v459_v57  ;;  %v577_v59 = vmul.f32 %v561_v23, %v542_v13  ;;  %v537_v50 = vsub.f32 %v1632_v34, %v1902_v0  ;;  %v1986_v0 = vld [vmem:[%s2524_s6] ss:$0 sm:$0xff] }
 0x15f   :  { %v451_v2 = vsub.f32 1.5, %v450_v33  ;;  %1276 = vmatmul.msk.bf16.gmra.mxu1 %vm76_vm0, %v616_v52 }
 0x160   :  { %v461_v11 = vsub.f32 1.5, %v460_v60  ;;  %v596_v15 = vadd.f32 %v1701_v9, %v577_v59 }
 0x161   :  { %v452_v5 = vmul.f32 %v1329_v41, %v451_v2  ;;  %v1333_v38 = vpop.eup %1332 }
 0x162   :  { %v462_v63 = vmul.f32 %v1331_v7, %v461_v11  ;;  %v1335_v25 = vpop.eup %1334  ;;  %v468_v62 = vmul.f32 %v1333_v38, %v361_v54  ;;  %v612_v17 = vmax.f32 %v596_v15, 0.0  ;;  %vm474_vm14 = vweird.f32 %v1333_v38 }
 0x163   :  { %v456_v16 = vsel %vm455_vm11, %v1329_v41, %v452_v5  ;;  %v478_v39 = vmul.f32 %v1335_v25, %v362_v32  ;;  %vm484_vm15 = vweird.f32 %v1335_v25  ;;  %vm475_vm2 = vmor %vm473_vm1, %vm474_vm14 }
 0x164   :  { %v466_v3 = vsel %vm465_vm13, %v1331_v7, %v462_v63  ;;  %v554_v26 = vmul.f32 %v1681_v45, %v456_v16  ;;  %v469_v37 = vmul.f32 %v1333_v38, %v468_v62  ;;  %v620_v47 = vpack.c.bf16 %v612_v17, %v611_v1  ;;  %vm485_vm4 = vmor %vm483_vm3, %vm484_vm15 }
 0x165   :  { %v555_v10 = vmul.f32 %v1681_v45, %v466_v3  ;;  %v479_v19 = vmul.f32 %v1335_v25, %v478_v39 }
 0x166   :  { %v570_v8 = vmul.f32 %v554_v26, %v535_v18  ;;  %v470_v36 = vmul.f32 0.5, %v469_v37  ;;  %1280 = vmatmul.msk.bf16.gmra.mxu3 %vm76_vm0, %v620_v47 }
 0x167   :  { %v571_v35 = vmul.f32 %v555_v10, %v536_v30  ;;  %v480_v6 = vmul.f32 0.5, %v479_v19 }
 0x168   :  { %v589_v21 = vadd.f32 %v1701_v9, %v570_v8  ;;  %v471_v4 = vsub.f32 1.5, %v470_v36 }
 0x169   :  { %v590_v28 = vadd.f32 %v1701_v9, %v571_v35  ;;  %v481_v40 = vsub.f32 1.5, %v480_v6 }
 0x16a   :  { %v605_v24 = vmax.f32 %v589_v21, 0.0  ;;  %v472_v14 = vmul.f32 %v1333_v38, %v471_v4 }
 0x16b   :  { %v606_v41 = vmax.f32 %v590_v28, 0.0  ;;  %v482_v43 = vmul.f32 %v1335_v25, %v481_v40 }
 0x16c   :  { %v476_v31 = vsel %vm475_vm2, %v1333_v38, %v472_v14 }
 0x16d   :  { %v617_v48 = vpack.c.bf16 %v606_v41, %v605_v24  ;;  %v486_v7 = vsel %vm485_vm4, %v1335_v25, %v482_v43  ;;  %v556_v49 = vmul.f32 %v1681_v45, %v476_v31 }
 0x16e   :  { %v557_v22 = vmul.f32 %v1681_v45, %v486_v7 }
 0x16f   :  { %1277 = vmatmul.msk.bf16.gmra.mxu1 %vm76_vm0, %v617_v48  ;;  %v572_v53 = vmul.f32 %v556_v49, %v537_v50 }
 0x170   :  { %v573_v51 = vmul.f32 %v557_v22, %v538_v44 }
 0x171   :  { %v591_v27 = vadd.f32 %v1701_v9, %v572_v53 }
 0x172   :  { %v592_v54 = vadd.f32 %v1701_v9, %v573_v51 }
 0x173   :  { %v607_v56 = vmax.f32 %v591_v27, 0.0 }
 0x174   :  { %v608_v32 = vmax.f32 %v592_v54, 0.0 }
 0x176   :  { %v618_v46 = vpack.c.bf16 %v608_v32, %v607_v56 }
 0x17f   :  { %1278 = vmatmul.msk.bf16.gmra.mxu1 %vm76_vm0, %v618_v46 }
 0x1a5   :  { %v1973_v13 = vpop.f32.mrf.mxu1 }
 0x1ad   :  { %v1975_v42 = vpop.f32.mrf.mxu1 }
 0x1b5   :  { %v1977_v58 = vpop.f32.mrf.mxu1 }
 0x1bd   :  { %v1979_v45 = vpop.f32.mrf.mxu1 }
 0x1cc   :  { %v1981_v34 = vpop.f32.mrf.mxu1 }
 0x1cd   :  { %v2068_v49 = vadd.f32 %v1986_v0, %v1981_v34  ;;  %v2087_v34 = vadd.f32 %v1986_v0, %v1979_v45  ;;  %v2102_v45 = vadd.f32 %v1986_v0, %v1973_v13 }
 0x1cf   :  { %v776_v54 = vmul.f32 %v2068_v49, %v2068_v49  ;;  %v720_v32 = vsel %vm76_vm0, %v2068_v49, 0.0 }
 0x1d1   :  { %v800_v56 = vsel %vm76_vm0, %v776_v54, 0.0 }
 0x1d2   :  { %v696_v9 = vpop.f32.mrf.mxu3 }
 0x1d3   :  { %v1989_v20 = vadd.f32 %v1986_v0, %v696_v9 }
 0x1d4   :  { %v1991_v57 = vpop.f32.mrf.mxu1 }
 0x1d5   :  { %v744_v33 = vsel %vm76_vm0, %v1989_v20, 0.0  ;;  %v784_v29 = vmul.f32 %v1989_v20, %v1989_v20  ;;  %v2078_v27 = vadd.f32 %v1986_v0, %v1991_v57  ;;  %v2093_v57 = vadd.f32 %v1986_v0, %v1977_v58 }
 0x1d6   :  { %745 = vadd.xlane.f32.xlu0 %v744_v33 }
 0x1d7   :  { %v824_v23 = vsel %vm76_vm0, %v784_v29, 0.0  ;;  %v777_v46 = vmul.f32 %v2078_v27, %v2078_v27  ;;  %v723_v9 = vsel %vm76_vm0, %v2078_v27, 0.0  ;;  %v717_v29 = vsel %vm76_vm0, %v2087_v34, 0.0 }
 0x1d8   :  { %825 = vadd.xlane.f32.xlu2 %v824_v23  ;;  %v774_v23 = vmul.f32 %v2093_v57, %v2093_v57 }
 0x1d9   :  { %v803_v33 = vsel %vm76_vm0, %v777_v46, 0.0  ;;  %v1288_v46 = vld [vmem:[%s2527_s9] sm:$0xff] }
 0x1da   :  { %v698_v60 = vpop.f32.mrf.mxu3  ;;  %v794_v58 = vsel %vm76_vm0, %v774_v23, 0.0 }
 0x1db   :  { %v1999_v61 = vadd.f32 %v1986_v0, %v698_v60  ;;  %v714_v60 = vsel %vm76_vm0, %v2093_v57, 0.0 }
 0x1dc   :  { %v681_v2 = vpop.f32.mrf.mxu1 }
 0x1dd   :  { %v747_v52 = vsel %vm76_vm0, %v1999_v61, 0.0  ;;  %v785_v59 = vmul.f32 %v1999_v61, %v1999_v61  ;;  %v2047_v40 = vadd.f32 %v1986_v0, %v681_v2  ;;  %v2109_v2 = vadd.f32 %v1986_v0, %v1975_v42 }
 0x1de   :  { %748 = vadd.xlane.f32.xlu1 %v747_v52  ;;  %v708_v52 = vsel %vm76_vm0, %v2102_v45, 0.0 }
 0x1df   :  { %v827_v11 = vsel %vm76_vm0, %v785_v59, 0.0  ;;  %v726_v48 = vsel %vm76_vm0, %v2047_v40, 0.0  ;;  %v778_v51 = vmul.f32 %v2047_v40, %v2047_v40  ;;  %v775_v59 = vmul.f32 %v2087_v34, %v2087_v34 }
 0x1e0   :  { %828 = vadd.xlane.f32.xlu0 %v827_v11  ;;  %v773_v11 = vmul.f32 %v2109_v2, %v2109_v2 }
 0x1e1   :  { %v806_v53 = vsel %vm76_vm0, %v778_v51, 0.0  ;;  %v797_v13 = vsel %vm76_vm0, %v775_v59, 0.0 }
 0x1e2   :  { %v791_v42 = vsel %vm76_vm0, %v773_v11, 0.0 }
 0x1e4   :  { %v683_v12 = vpop.f32.mrf.mxu1 }
 0x1e5   :  { %v2055_v43 = vadd.f32 %v1986_v0, %v683_v12  ;;  %v711_v12 = vsel %vm76_vm0, %v2109_v2, 0.0 }
 0x1e7   :  { %v779_v22 = vmul.f32 %v2055_v43, %v2055_v43  ;;  %v729_v44 = vsel %vm76_vm0, %v2055_v43, 0.0 }
 0x1e9   :  { %v701_v5 = vpop.f32.mrf.mxu3  ;;  %v809_v50 = vsel %vm76_vm0, %v779_v22, 0.0 }
 0x1ea   :  { %v2007_v15 = vadd.f32 %v1986_v0, %v701_v5 }
 0x1ec   :  { %v750_v38 = vsel %vm76_vm0, %v2007_v15, 0.0  ;;  %v786_v63 = vmul.f32 %v2007_v15, %v2007_v15  ;;  %v686_v25 = vpop.f32.mrf.mxu1 }
 0x1ed   :  { %751 = vadd.xlane.f32.xlu2 %v750_v38  ;;  %v2014_v16 = vadd.f32 %v1986_v0, %v686_v25 }
 0x1ee   :  { %v830_v62 = vsel %vm76_vm0, %v786_v63, 0.0 }
 0x1ef   :  { %831 = vadd.xlane.f32.xlu1 %v830_v62  ;;  %v780_v18 = vmul.f32 %v2014_v16, %v2014_v16  ;;  %v732_v36 = vsel %vm76_vm0, %v2014_v16, 0.0 }
 0x1f1   :  { %v703_v1 = vpop.f32.mrf.mxu3  ;;  %v812_v37 = vsel %vm76_vm0, %v780_v18, 0.0 }
 0x1f2   :  { %v2018_v17 = vadd.f32 %v1986_v0, %v703_v1 }
 0x1f4   :  { %v753_v3 = vsel %vm76_vm0, %v2018_v17, 0.0  ;;  %v787_v39 = vmul.f32 %v2018_v17, %v2018_v17  ;;  %v688_v26 = vpop.f32.mrf.mxu1 }
 0x1f5   :  { %754 = vadd.xlane.f32.xlu0 %v753_v3  ;;  %v2029_v47 = vadd.f32 %v1986_v0, %v688_v26 }
 0x1f6   :  { %v833_v30 = vsel %vm76_vm0, %v787_v39, 0.0 }
 0x1f7   :  { %834 = vadd.xlane.f32.xlu2 %v833_v30  ;;  %813 = vadd.xlane.f32.xlu1 %v812_v37  ;;  %v735_v10 = vsel %vm76_vm0, %v2029_v47, 0.0  ;;  %v781_v31 = vmul.f32 %v2029_v47, %v2029_v47 }
 0x1f9   :  { %v815_v7 = vsel %vm76_vm0, %v781_v31, 0.0 }
 0x1fc   :  { %v691_v19 = vpop.f32.mrf.mxu1 }
 0x1fd   :  { %736 = vadd.xlane.f32.xlu0 %v735_v10  ;;  %v2034_v8 = vadd.f32 %v1986_v0, %v691_v19 }
 0x1ff   :  { %733 = vadd.xlane.f32.xlu2 %v732_v36  ;;  %v738_v35 = vsel %vm76_vm0, %v2034_v8, 0.0  ;;  %v782_v6 = vmul.f32 %v2034_v8, %v2034_v8 }
 0x200   :  { %739 = vadd.xlane.f32.xlu1 %v738_v35 }
 0x201   :  { %v818_v21 = vsel %vm76_vm0, %v782_v6, 0.0 }
 0x204   :  { %v693_v4 = vpop.f32.mrf.mxu1 }
 0x205   :  { %819 = vadd.xlane.f32.xlu0 %v818_v21  ;;  %v2044_v28 = vadd.f32 %v1986_v0, %v693_v4  ;;  %v772_v0 = vmul.f32 %v2102_v45, %v2102_v45 }
 0x207   :  { %v741_v24 = vsel %vm76_vm0, %v2044_v28, 0.0  ;;  %v783_v14 = vmul.f32 %v2044_v28, %v2044_v28  ;;  %v788_v5 = vsel %vm76_vm0, %v772_v0, 0.0 }
 0x208   :  { %742 = vadd.xlane.f32.xlu2 %v741_v24 }
 0x209   :  { %v821_v41 = vsel %vm76_vm0, %v783_v14, 0.0 }
 0x20a   :  { %822 = vadd.xlane.f32.xlu1 %v821_v41 }
 0x20d   :  { %727 = vadd.xlane.f32.xlu0 %v726_v48 }
 0x210   :  { %816 = vadd.xlane.f32.xlu2 %v815_v7 }
 0x212   :  { %730 = vadd.xlane.f32.xlu1 %v729_v44 }
 0x215   :  { %810 = vadd.xlane.f32.xlu0 %v809_v50 }
 0x218   :  { %807 = vadd.xlane.f32.xlu2 %v806_v53 }
 0x21a   :  { %721 = vadd.xlane.f32.xlu1 %v720_v32 }
 0x21d   :  { %801 = vadd.xlane.f32.xlu0 %v800_v56 }
 0x220   :  { %724 = vadd.xlane.f32.xlu2 %v723_v9 }
 0x222   :  { %804 = vadd.xlane.f32.xlu1 %v803_v33 }
 0x225   :  { %718 = vadd.xlane.f32.xlu0 %v717_v29 }
 0x228   :  { %715 = vadd.xlane.f32.xlu2 %v714_v60 }
 0x22a   :  { %795 = vadd.xlane.f32.xlu1 %v794_v58 }
 0x22d   :  { %709 = vadd.xlane.f32.xlu0 %v708_v52 }
 0x230   :  { %798 = vadd.xlane.f32.xlu2 %v797_v13 }
 0x232   :  { %712 = vadd.xlane.f32.xlu1 %v711_v12 }
 0x235   :  { %792 = vadd.xlane.f32.xlu0 %v791_v42 }
 0x238   :  { %789 = vadd.xlane.f32.xlu2 %v788_v5 }
 0x249   :  { %v746_v38 = vpop.xlane.xlu0 %745 }
 0x24a   :  { %v2125_v63 = vmul.f32 %v746_v38, %v1649_v55 }
 0x24b   :  { %v826_v25 = vpop.xlane.xlu2 %825 }
 0x24c   :  { %v864_v62 = vmul.f32 %v2125_v63, %v2125_v63  ;;  %v848_v1 = vmul.f32 %v826_v25, %v1649_v55 }
 0x24e   :  { %v880_v18 = vsub.f32 %v848_v1, %v864_v62 }
 0x250   :  { %v896_v39 = vmax.f32 %v880_v18, 0.0 }
 0x251   :  { %v749_v3 = vpop.xlane.xlu1 %748 }
 0x252   :  { %v2131_v26 = vmul.f32 %v749_v3, %v1649_v55  ;;  %v912_v19 = vadd.f32 1e-05, %v896_v39 }
 0x253   :  { %v829_v30 = vpop.xlane.xlu0 %828 }
 0x254   :  { %v865_v37 = vmul.f32 %v2131_v26, %v2131_v26  ;;  %v849_v10 = vmul.f32 %v829_v30, %v1649_v55  ;;  %1336 = vrsqrt.f32 %v912_v19  ;;  %vm1042_vm8 = vweird.f32 %v912_v19 }
 0x256   :  { %v881_v36 = vsub.f32 %v849_v10, %v865_v37 }
 0x258   :  { %v897_v35 = vmax.f32 %v881_v36, 0.0 }
 0x25a   :  { %v913_v6 = vadd.f32 1e-05, %v897_v35  ;;  %v2139_v24 = vpop.eup %1336 }
 0x25b   :  { %v1037_v7 = vmul.f32 %v2139_v24, %v912_v19  ;;  %vm1043_vm5 = vweird.f32 %v2139_v24 }
 0x25c   :  { %1338 = vrsqrt.f32 %v913_v6  ;;  %vm1052_vm7 = vweird.f32 %v913_v6  ;;  %vm2175_vm10 = vmor %vm1042_vm8, %vm1043_vm5 }
 0x25d   :  { %v1038_v54 = vmul.f32 %v2139_v24, %v1037_v7 }
 0x25f   :  { %v1039_v58 = vmul.f32 0.5, %v1038_v54 }
 0x260   :  { %v752_v21 = vpop.xlane.xlu2 %751 }
 0x261   :  { %v2137_v4 = vmul.f32 %v752_v21, %v1649_v55  ;;  %v1040_v42 = vsub.f32 1.5, %v1039_v58  ;;  %v1088_v58 = vsub.f32 %v1989_v20, %v2125_v63  ;;  %v2222_v63 = vld [vmem:[%s2526_s8] ss:$0 sm:$0xff] }
 0x262   :  { %v832_v14 = vpop.xlane.xlu1 %831  ;;  %v1339_v31 = vpop.eup %1338 }
 0x263   :  { %v866_v41 = vmul.f32 %v2137_v4, %v2137_v4  ;;  %v850_v48 = vmul.f32 %v832_v14, %v1649_v55  ;;  %v1047_v44 = vmul.f32 %v1339_v31, %v913_v6  ;;  %vm1053_vm6 = vweird.f32 %v1339_v31 }
 0x264   :  { %v1041_v3 = vmul.f32 %v2139_v24, %v1040_v42  ;;  %vm2169_vm9 = vmor %vm1052_vm7, %vm1053_vm6 }
 0x265   :  { %v882_v22 = vsub.f32 %v850_v48, %v866_v41  ;;  %v1048_v51 = vmul.f32 %v1339_v31, %v1047_v44  ;;  %v2182_v41 = vld [vmem:[%s2525_s7] ss:$0 sm:$0xff] }
 0x266   :  { %v1045_v44 = vsel %vm2175_vm10, %v2139_v24, %v1041_v3 }
 0x267   :  { %v898_v50 = vmax.f32 %v882_v22, 0.0  ;;  %v1049_v23 = vmul.f32 0.5, %v1048_v51 }
 0x268   :  { %v755_v53 = vpop.xlane.xlu0 %754 }
 0x269   :  { %v914_v32 = vadd.f32 1e-05, %v898_v50  ;;  %v2147_v56 = vmul.f32 %v755_v53, %v1649_v55  ;;  %v1050_v59 = vsub.f32 1.5, %v1049_v23 }
 0x26a   :  { %v835_v9 = vpop.xlane.xlu2 %834  ;;  %v814_v33 = vpop.xlane.xlu1 %813 }
 0x26b   :  { %1340 = vrsqrt.f32 %v914_v32  ;;  %v867_v29 = vmul.f32 %v2147_v56, %v2147_v56  ;;  %v851_v60 = vmul.f32 %v835_v9, %v1649_v55  ;;  %v1051_v62 = vmul.f32 %v1339_v31, %v1050_v59 }
 0x26c   :  { %1184 = vxpose.xlu1.c.b16.start.end [1/1] (short) (narrow) %v1288_v46, 16  ;;  %v844_v39 = vmul.f32 %v814_v33, %v1649_v55  ;;  %vm1062_vm12 = vweird.f32 %v914_v32  ;;  %v1107_v33 = vmul.f32 %v2182_v41, %v1045_v44  ;;  %v1091_v44 = vsub.f32 %v2018_v17, %v2147_v56 }
 0x26d   :  { %v883_v52 = vsub.f32 %v851_v60, %v867_v29  ;;  %v1055_v19 = vsel %vm2169_vm9, %v1339_v31, %v1051_v62  ;;  %v1089_v29 = vsub.f32 %v1999_v61, %v2131_v26 }
 0x26e   :  { %v1108_v31 = vmul.f32 %v2182_v41, %v1055_v19  ;;  %v1123_v62 = vmul.f32 %v1107_v33, %v1088_v58 }
 0x26f   :  { %v899_v13 = vmax.f32 %v883_v52, 0.0 }
 0x270   :  { %v737_v11 = vpop.xlane.xlu0 %736  ;;  %v1124_v42 = vmul.f32 %v1108_v31, %v1089_v29  ;;  %v1142_v21 = vadd.f32 %v2222_v63, %v1123_v62 }
 0x271   :  { %v1341_v12 = vpop.eup %1340  ;;  %v2155_v5 = vadd.f32 1e-05, %v899_v13 }
 0x272   :  { %v1057_v0 = vmul.f32 %v1341_v12, %v914_v32  ;;  %v734_v38 = vpop.xlane.xlu2 %733  ;;  %vm1063_vm11 = vweird.f32 %v1341_v12  ;;  %v1158_v56 = vmax.f32 %v1142_v21, 0.0 }
 0x273   :  { %v2159_v25 = vmul.f32 %v734_v38, %v1649_v55  ;;  %1342 = vrsqrt.f32 %v2155_v5  ;;  %v740_v18 = vpop.xlane.xlu1 %739  ;;  %vm2199_vm13 = vmor %vm1062_vm12, %vm1063_vm11  ;;  %vm1072_vm15 = vweird.f32 %v2155_v5 }
 0x274   :  { %v1058_v1 = vmul.f32 %v1341_v12, %v1057_v0  ;;  %v2167_v37 = vmul.f32 %v740_v18, %v1649_v55  ;;  %v2215_v0 = vmul.f32 %v737_v11, %v1649_v55  ;;  %v1090_v11 = vsub.f32 %v2007_v15, %v2137_v4 }
 0x275   :  { %v860_v30 = vmul.f32 %v2159_v25, %v2159_v25 }
 0x276   :  { %v1059_v10 = vmul.f32 0.5, %v1058_v1  ;;  %v862_v7 = vmul.f32 %v2167_v37, %v2167_v37 }
 0x277   :  { %v876_v35 = vsub.f32 %v844_v39, %v860_v30  ;;  %v1143_v30 = vadd.f32 %v2222_v63, %v1124_v42 }
 0x278   :  { %v1060_v14 = vsub.f32 1.5, %v1059_v10  ;;  %v820_v6 = vpop.xlane.xlu0 %819 }
 0x279   :  { %v892_v48 = vmax.f32 %v876_v35, 0.0  ;;  %v846_v22 = vmul.f32 %v820_v6, %v1649_v55  ;;  %v1343_v50 = vpop.eup %1342 }
 0x27a   :  { %v1061_v51 = vmul.f32 %v1341_v12, %v1060_v14  ;;  %v1067_v53 = vmul.f32 %v1343_v50, %v2155_v5  ;;  %vm1073_vm14 = vweird.f32 %v1343_v50  ;;  %v861_v14 = vmul.f32 %v2215_v0, %v2215_v0 }
 0x27b   :  { %v2193_v54 = vadd.f32 1e-05, %v892_v48  ;;  %v878_v46 = vsub.f32 %v846_v22, %v862_v7  ;;  %v743_v9 = vpop.xlane.xlu2 %742  ;;  %vm1074_vm1 = vmor %vm1072_vm15, %vm1073_vm14 }
 0x27c   :  { %v1068_v24 = vmul.f32 %v1343_v50, %v1067_v53  ;;  %v2207_v52 = vmul.f32 %v743_v9, %v1649_v55  ;;  %v1065_v59 = vsel %vm2199_vm13, %v1341_v12, %v1061_v51 }
 0x27d   :  { %1344 = vrsqrt.f32 %v2193_v54  ;;  %v894_v60 = vmax.f32 %v878_v46, 0.0  ;;  %v823_v32 = vpop.xlane.xlu1 %822  ;;  %v1109_v1 = vmul.f32 %v2182_v41, %v1065_v59  ;;  %v1159_v46 = vmax.f32 %v1143_v30, 0.0 }
 0x27e   :  { %v1069_v13 = vmul.f32 0.5, %v1068_v24  ;;  %v847_v26 = vmul.f32 %v823_v32, %v1649_v55  ;;  %v863_v38 = vmul.f32 %v2207_v52, %v2207_v52  ;;  %v1085_v59 = vsub.f32 %v2029_v47, %v2215_v0 }
 0x27f   :  { %v2211_v61 = vadd.f32 1e-05, %v894_v60  ;;  %v1125_v15 = vmul.f32 %v1109_v1, %v1090_v11  ;;  %vm1002_vm2 = vweird.f32 %v2193_v54 }
 0x280   :  { %v728_v20 = vpop.xlane.xlu0 %727  ;;  %v1070_v12 = vsub.f32 1.5, %v1069_v13  ;;  %v879_v18 = vsub.f32 %v847_v26, %v863_v38  ;;  %v1170_v26 = vpack.c.bf16 %v1159_v46, %v1158_v56 }
 0x281   :  { %1346 = vrsqrt.f32 %v2211_v61  ;;  %v2253_v9 = vmul.f32 %v728_v20, %v1649_v55  ;;  %v1144_v17 = vadd.f32 %v2222_v63, %v1125_v15  ;;  %vm1022_vm4 = vweird.f32 %v2211_v61 }
 0x282   :  { %v1071_v39 = vmul.f32 %v1343_v50, %v1070_v12  ;;  %v895_v36 = vmax.f32 %v879_v18, 0.0 }
 0x283   :  { %v2226_v3 = vpop.eup %1344  ;;  %v817_v35 = vpop.xlane.xlu2 %816  ;;  %v858_v38 = vmul.f32 %v2253_v9, %v2253_v9 }
 0x284   :  { %v997_v10 = vmul.f32 %v2226_v3, %v2193_v54  ;;  %v845_v6 = vmul.f32 %v817_v35, %v1649_v55  ;;  %v1075_v19 = vsel %vm1074_vm1, %v1343_v50, %v1071_v39  ;;  %v2239_v5 = vadd.f32 1e-05, %v895_v36 }
 0x285   :  { %v731_v48 = vpop.xlane.xlu1 %730  ;;  %v1110_v7 = vmul.f32 %v2182_v41, %v1075_v19  ;;  %vm1003_vm3 = vweird.f32 %v2226_v3  ;;  %v1160_v36 = vmax.f32 %v1144_v17, 0.0 }
 0x286   :  { %v998_v4 = vmul.f32 %v2226_v3, %v997_v10  ;;  %v877_v51 = vsub.f32 %v845_v6, %v861_v14  ;;  %v2247_v53 = vmul.f32 %v731_v48, %v1649_v55  ;;  %1348 = vrsqrt.f32 %v2239_v5  ;;  %vm2280_vm6 = vmor %vm1002_vm2, %vm1003_vm3 }
 0x287   :  { %v2242_v22 = vpop.eup %1346  ;;  %v1126_v32 = vmul.f32 %v1110_v7, %v1091_v44  ;;  %vm1032_vm9 = vweird.f32 %v2239_v5 }
 0x288   :  { %v999_v31 = vmul.f32 0.5, %v998_v4  ;;  %v1017_v50 = vmul.f32 %v2242_v22, %v2211_v61  ;;  %v811_v33 = vpop.xlane.xlu0 %810  ;;  %v893_v29 = vmax.f32 %v877_v51, 0.0  ;;  %v859_v23 = vmul.f32 %v2247_v53, %v2247_v53 }
 0x289   :  { %v843_v58 = vmul.f32 %v811_v33, %v1649_v55  ;;  %v1145_v12 = vadd.f32 %v2222_v63, %v1126_v32  ;;  %vm1023_vm5 = vweird.f32 %v2242_v22 }
 0x28a   :  { %v1000_v24 = vsub.f32 1.5, %v999_v31  ;;  %v1018_v60 = vmul.f32 %v2242_v22, %v1017_v50  ;;  %v2263_v13 = vadd.f32 1e-05, %v893_v29  ;;  %v1084_v31 = vsub.f32 %v2014_v16, %v2159_v25  ;;  %vm2303_vm7 = vmor %vm1022_vm4, %vm1023_vm5 }
 0x28b   :  { %v875_v20 = vsub.f32 %v843_v58, %v859_v23  ;;  %v808_v62 = vpop.xlane.xlu2 %807  ;;  %v1161_v35 = vmax.f32 %v1145_v12, 0.0  ;;  %v1086_v50 = vsub.f32 %v2034_v8, %v2167_v37 }
 0x28c   :  { %v1019_v42 = vmul.f32 0.5, %v1018_v60  ;;  %v1001_v1 = vmul.f32 %v2226_v3, %v1000_v24  ;;  %1350 = vrsqrt.f32 %v2263_v13  ;;  %v842_v18 = vmul.f32 %v808_v62, %v1649_v55  ;;  %v2272_v11 = vpop.eup %1348 }
 0x28d   :  { %v891_v30 = vmax.f32 %v875_v20, 0.0  ;;  %v722_v10 = vpop.xlane.xlu1 %721  ;;  %v1027_v21 = vmul.f32 %v2272_v11, %v2239_v5  ;;  %v1171_v48 = vpack.c.bf16 %v1161_v35, %v1160_v36  ;;  %v1222_v24 = vsel %vm76_vm0, %v1170_v26, 0 }
 0x28e   :  { %v1020_v39 = vsub.f32 1.5, %v1019_v42  ;;  %v874_v14 = vsub.f32 %v842_v18, %v858_v38  ;;  %v2288_v4 = vmul.f32 %v722_v10, %v1649_v55  ;;  %v1005_v44 = vsel %vm2280_vm6, %v2226_v3, %v1001_v1 }
 0x28f   :  { %v2285_v15 = vadd.f32 1e-05, %v891_v30  ;;  %v1028_v51 = vmul.f32 %v2272_v11, %v1027_v21  ;;  %v1225_v8 = vsel %vm76_vm0, %v1171_v48, 0  ;;  %v1103_v37 = vmul.f32 %v2182_v41, %v1005_v44 }
 0x290   :  { %v1021_v19 = vmul.f32 %v2242_v22, %v1020_v39  ;;  %v802_v7 = vpop.xlane.xlu0 %801  ;;  %v890_v54 = vmax.f32 %v874_v14, 0.0  ;;  %v856_v3 = vmul.f32 %v2288_v4, %v2288_v4  ;;  %1227 = vmatpush.bf16.xpose.msra.mxu2 %v1225_v8  ;;  %vm1033_vm8 = vweird.f32 %v2272_v11 }
 0x291   :  { %v840_v46 = vmul.f32 %v802_v7, %v1649_v55  ;;  %1352 = vrsqrt.f32 %v2285_v15  ;;  %v1029_v23 = vmul.f32 0.5, %v1028_v51  ;;  %v1082_v26 = vsub.f32 %v2047_v40, %v2253_v9  ;;  %vm2342_vm10 = vmor %vm1032_vm9, %vm1033_vm8 }
 0x292   :  { %v2310_v29 = vpop.eup %1350  ;;  %v2312_v16 = vadd.f32 1e-05, %v890_v54  ;;  %v1025_v25 = vsel %vm2303_vm7, %v2242_v22, %v1021_v19  ;;  %v1087_v22 = vsub.f32 %v2044_v28, %v2207_v52  ;;  %v1119_v39 = vmul.f32 %v1103_v37, %v1084_v31 }
 0x293   :  { %v1007_v61 = vmul.f32 %v2310_v29, %v2263_v13  ;;  %v872_v17 = vsub.f32 %v840_v46, %v856_v3  ;;  %v725_v56 = vpop.xlane.xlu2 %724  ;;  %v1030_v60 = vsub.f32 1.5, %v1029_v23  ;;  %v1105_v32 = vmul.f32 %v2182_v41, %v1025_v25 }
 0x294   :  { %1354 = vrsqrt.f32 %v2312_v16  ;;  %v2324_v58 = vmul.f32 %v725_v56, %v1649_v55  ;;  %v1083_v36 = vsub.f32 %v2055_v43, %v2247_v53  ;;  %vm1012_vm11 = vweird.f32 %v2263_v13 }
 0x295   :  { %v1008_v42 = vmul.f32 %v2310_v29, %v1007_v61  ;;  %v888_v38 = vmax.f32 %v872_v17, 0.0  ;;  %v805_v20 = vpop.xlane.xlu1 %804  ;;  %v1031_v62 = vmul.f32 %v2272_v11, %v1030_v60  ;;  %v1121_v14 = vmul.f32 %v1105_v32, %v1086_v50 }
 0x296   :  { %v857_v12 = vmul.f32 %v2324_v58, %v2324_v58  ;;  %v841_v1 = vmul.f32 %v805_v20, %v1649_v55  ;;  %vm1013_vm12 = vweird.f32 %v2310_v29  ;;  %vm992_vm13 = vweird.f32 %v2285_v15 }
 0x297   :  { %v2337_v18 = vpop.eup %1352  ;;  %v1009_v28 = vmul.f32 0.5, %v1008_v42  ;;  %v2340_v52 = vadd.f32 1e-05, %v888_v38  ;;  %v1035_v5 = vsel %vm2342_vm10, %v2272_v11, %v1031_v62  ;;  %v2365_v11 = vadd.f32 %v2222_v63, %v1119_v39  ;;  %vm2375_vm14 = vmor %vm1012_vm11, %vm1013_vm12 }
 0x298   :  { %v719_v30 = vpop.xlane.xlu0 %718  ;;  %v987_v35 = vmul.f32 %v2337_v18, %v2285_v15  ;;  %v873_v21 = vsub.f32 %v841_v1, %v857_v12  ;;  %1228 = vmatpush.bf16.xpose.msra.mxu2 %v1222_v24  ;;  %v1106_v46 = vmul.f32 %v2182_v41, %v1035_v5  ;;  %v1140_v3 = vadd.f32 %v2222_v63, %v1121_v14 }
 0x299   :  { %v1010_v6 = vsub.f32 1.5, %v1009_v28  ;;  %1356 = vrsqrt.f32 %v2340_v52  ;;  %vm993_vm15 = vweird.f32 %v2337_v18  ;;  %vm982_vm1 = vweird.f32 %v2312_v16 }
 0x29a   :  { %v2355_v19 = vpop.eup %1354  ;;  %v988_v48 = vmul.f32 %v2337_v18, %v987_v35  ;;  %v889_v7 = vmax.f32 %v873_v21, 0.0  ;;  %v1122_v37 = vmul.f32 %v1106_v46, %v1087_v22  ;;  %v1154_v22 = vmax.f32 %v2365_v11, 0.0  ;;  %vm2403_vm2 = vmor %vm992_vm13, %vm993_vm15 }
 0x29b   :  { %v1011_v44 = vmul.f32 %v2310_v29, %v1010_v6  ;;  %v977_v51 = vmul.f32 %v2355_v19, %v2312_v16  ;;  %v716_v54 = vpop.xlane.xlu2 %715  ;;  %v2397_v62 = vmul.f32 %v719_v30, %v1649_v55  ;;  %v1156_v12 = vmax.f32 %v1140_v3, 0.0 }
 0x29c   :  { %v989_v31 = vmul.f32 0.5, %v988_v48  ;;  %v2367_v50 = vadd.f32 1e-05, %v889_v7  ;;  %v2370_v33 = vmul.f32 %v716_v54, %v1649_v55  ;;  %v1141_v42 = vadd.f32 %v2222_v63, %v1122_v37 }
 0x29d   :  { %v978_v8 = vmul.f32 %v2355_v19, %v977_v51  ;;  %v796_v25 = vpop.xlane.xlu1 %795  ;;  %v1015_v13 = vsel %vm2375_vm14, %v2310_v29, %v1011_v44  ;;  %vm983_vm3 = vweird.f32 %v2355_v19  ;;  %vm962_vm4 = vweird.f32 %v2340_v52 }
 0x29e   :  { %v990_v61 = vsub.f32 1.5, %v989_v31  ;;  %1358 = vrsqrt.f32 %v2367_v50  ;;  %v854_v17 = vmul.f32 %v2370_v33, %v2370_v33  ;;  %v838_v60 = vmul.f32 %v796_v25, %v1649_v55  ;;  %vm2433_vm5 = vmor %vm982_vm1, %vm983_vm3 }
 0x29f   :  { %v2388_v56 = vpop.eup %1356  ;;  %v979_v24 = vmul.f32 0.5, %v978_v8  ;;  %v1157_v28 = vmax.f32 %v1141_v42, 0.0  ;;  %v1104_v10 = vmul.f32 %v2182_v41, %v1015_v13  ;;  %v855_v44 = vmul.f32 %v2397_v62, %v2397_v62 }
 0x2a0   :  { %v710_v32 = vpop.xlane.xlu0 %709  ;;  %v991_v38 = vmul.f32 %v2337_v18, %v990_v61  ;;  %v957_v20 = vmul.f32 %v2388_v56, %v2340_v52  ;;  %v870_v39 = vsub.f32 %v838_v60, %v854_v17  ;;  %vm972_vm6 = vweird.f32 %v2367_v50 }
 0x2a1   :  { %v980_v1 = vsub.f32 1.5, %v979_v24  ;;  %v1169_v6 = vpack.c.bf16 %v1157_v28, %v1156_v12  ;;  %v1120_v5 = vmul.f32 %v1104_v10, %v1085_v59  ;;  %v2421_v51 = vmul.f32 %v710_v32, %v1649_v55 }
 0x2a2   :  { %v958_v35 = vmul.f32 %v2388_v56, %v957_v20  ;;  %v995_v30 = vsel %vm2403_vm2, %v2337_v18, %v991_v38  ;;  %v886_v21 = vmax.f32 %v870_v39, 0.0  ;;  %vm963_vm7 = vweird.f32 %v2388_v56 }
 0x2a3   :  { %v981_v15 = vmul.f32 %v2355_v19, %v980_v1  ;;  %v799_v14 = vpop.xlane.xlu2 %798  ;;  %v1219_v11 = vsel %vm76_vm0, %v1169_v6, 0  ;;  %v1102_v47 = vmul.f32 %v2182_v41, %v995_v30  ;;  %v1139_v8 = vadd.f32 %v2222_v63, %v1120_v5  ;;  %vm2461_vm9 = vmor %vm962_vm4, %vm963_vm7 }
 0x2a4   :  { %v1359_v48 = vpop.eup %1358  ;;  %v959_v7 = vmul.f32 0.5, %v958_v35  ;;  %v839_v54 = vmul.f32 %v799_v14, %v1649_v55  ;;  %v2425_v46 = vadd.f32 1e-05, %v886_v21  ;;  %1229 = vmatpush.bf16.xpose.msra.mxu2 %v1219_v11  ;;  %v852_v38 = vmul.f32 %v2421_v51, %v2421_v51 }
 0x2a5   :  { %v967_v18 = vmul.f32 %v1359_v48, %v2367_v50  ;;  %v713_v31 = vpop.xlane.xlu1 %712  ;;  %v985_v16 = vsel %vm2433_vm5, %v2355_v19, %v981_v15  ;;  %v1155_v32 = vmax.f32 %v1139_v8, 0.0  ;;  %vm973_vm8 = vweird.f32 %v1359_v48 }
 0x2a6   :  { %v960_v59 = vsub.f32 1.5, %v959_v7  ;;  %v871_v3 = vsub.f32 %v839_v54, %v855_v44  ;;  %v2438_v23 = vmul.f32 %v713_v31, %v1649_v55  ;;  %1360 = vrsqrt.f32 %v2425_v46  ;;  %vm974_vm10 = vmor %vm972_vm6, %vm973_vm8 }
 0x2a7   :  { %v968_v25 = vmul.f32 %v1359_v48, %v967_v18  ;;  %v1101_v42 = vmul.f32 %v2182_v41, %v985_v16  ;;  %v1118_v19 = vmul.f32 %v1102_v47, %v1083_v36  ;;  %v1168_v28 = vpack.c.bf16 %v1155_v32, %v1154_v22 }
 0x2a8   :  { %v793_v37 = vpop.xlane.xlu0 %792  ;;  %v961_v61 = vmul.f32 %v2388_v56, %v960_v59  ;;  %v887_v17 = vmax.f32 %v871_v3, 0.0  ;;  %v853_v13 = vmul.f32 %v2438_v23, %v2438_v23  ;;  %v1080_v40 = vsub.f32 %v2068_v49, %v2288_v4 }
 0x2a9   :  { %v969_v24 = vmul.f32 0.5, %v968_v25  ;;  %v837_v60 = vmul.f32 %v793_v37, %v1649_v55  ;;  %v1117_v10 = vmul.f32 %v1101_v42, %v1082_v26  ;;  %v1137_v43 = vadd.f32 %v2222_v63, %v1118_v19 }
 0x2aa   :  { %v2454_v20 = vadd.f32 1e-05, %v887_v17  ;;  %v965_v53 = vsel %vm2461_vm9, %v2388_v56, %v961_v61  ;;  %v1216_v15 = vsel %vm76_vm0, %v1168_v28, 0  ;;  %v1081_v5 = vsub.f32 %v2078_v27, %v2324_v58 }
 0x2ab   :  { %v970_v29 = vsub.f32 1.5, %v969_v24  ;;  %v869_v1 = vsub.f32 %v837_v60, %v853_v13  ;;  %v790_v39 = vpop.xlane.xlu2 %789  ;;  %v1136_v22 = vadd.f32 %v2222_v63, %v1117_v10  ;;  %v1153_v26 = vmax.f32 %v1137_v43, 0.0 }
 0x2ac   :  { %1362 = vrsqrt.f32 %v2454_v20  ;;  %v836_v35 = vmul.f32 %v790_v39, %v1649_v55  ;;  %v1361_v52 = vpop.eup %1360  ;;  %1230 = vmatpush.bf16.xpose.msra.mxu2 %v1216_v15  ;;  %v1099_v6 = vmul.f32 %v2182_v41, %v965_v53  ;;  %vm942_vm12 = vweird.f32 %v2425_v46 }
 0x2ad   :  { %v971_v36 = vmul.f32 %v1359_v48, %v970_v29  ;;  %v885_v30 = vmax.f32 %v869_v1, 0.0  ;;  %v937_v55 = vmul.f32 %v1361_v52, %v2425_v46  ;;  %v1152_v21 = vmax.f32 %v1136_v22, 0.0 }
 0x2ae   :  { %v868_v9 = vsub.f32 %v836_v35, %v852_v38  ;;  %v1115_v50 = vmul.f32 %v1099_v6, %v1080_v40  ;;  %vm943_vm11 = vweird.f32 %v1361_v52  ;;  %v1078_v42 = vsub.f32 %v2093_v57, %v2370_v33 }
 0x2af   :  { %v901_v56 = vadd.f32 1e-05, %v885_v30  ;;  %v975_v14 = vsel %vm974_vm10, %v1359_v48, %v971_v36  ;;  %v938_v7 = vmul.f32 %v1361_v52, %v937_v55  ;;  %v1167_v4 = vpack.c.bf16 %v1153_v26, %v1152_v21  ;;  %vm944_vm13 = vmor %vm942_vm12, %vm943_vm11 }
 0x2b0   :  { %v884_v44 = vmax.f32 %v868_v9, 0.0  ;;  %v1100_v49 = vmul.f32 %v2182_v41, %v975_v14  ;;  %v1134_v48 = vadd.f32 %v2222_v63, %v1115_v50  ;;  %vm952_vm15 = vweird.f32 %v2454_v20 }
 0x2b1   :  { %1364 = vrsqrt.f32 %v901_v56  ;;  %v939_v18 = vmul.f32 0.5, %v938_v7  ;;  %v1213_v59 = vsel %vm76_vm0, %v1167_v4, 0  ;;  %v1079_v10 = vsub.f32 %v2087_v34, %v2397_v62 }
 0x2b2   :  { %v1363_v54 = vpop.eup %1362  ;;  %v900_v11 = vadd.f32 1e-05, %v884_v44  ;;  %v1116_v31 = vmul.f32 %v1100_v49, %v1081_v5  ;;  %v1150_v8 = vmax.f32 %v1134_v48, 0.0  ;;  %vm932_vm3 = vweird.f32 %v901_v56 }
 0x2b3   :  { %v947_v47 = vmul.f32 %v1363_v54, %v2454_v20  ;;  %v940_v0 = vsub.f32 1.5, %v939_v18  ;;  %vm953_vm14 = vweird.f32 %v1363_v54  ;;  %v1077_v34 = vsub.f32 %v2109_v2, %v2438_v23 }
 0x2b4   :  { %1366 = vrsqrt.f32 %v900_v11  ;;  %v1135_v27 = vadd.f32 %v2222_v63, %v1116_v31  ;;  %1231 = vmatpush.bf16.xpose.msra.mxu2 %v1213_v59  ;;  %vm954_vm1 = vmor %vm952_vm15, %vm953_vm14  ;;  %vm922_vm6 = vweird.f32 %v900_v11  ;;  %v1076_v26 = vsub.f32 %v2102_v45, %v2421_v51  ;;  %v1172_v45 = vld [vmem:[%s2528_s10] sm:$0xf] }
 0x2b5   :  { %v948_v58 = vmul.f32 %v1363_v54, %v947_v47  ;;  %v941_v3 = vmul.f32 %v1361_v52, %v940_v0  ;;  %v1395_v51 = vmov 0  }
 0x2b6   :  { %v1151_v25 = vmax.f32 %v1135_v27, 0.0  ;;  %1294 = vset.pattern.permute.xlu2 %v1395_v51  ;;  %1295 = vset.pattern.permute.xlu0 %v1395_v51 }
 0x2b7   :  { %v1365_v37 = vpop.eup %1364  ;;  %v949_v16 = vmul.f32 0.5, %v948_v58  ;;  %v945_v13 = vsel %vm944_vm13, %v1361_v52, %v941_v3  ;;  %1175 = vperm.xlu2 %1294, %v1172_v45  }
 0x2b8   :  { %v927_v61 = vmul.f32 %v1365_v37, %v901_v56  ;;  %v1166_v17 = vpack.c.bf16 %v1151_v25, %v1150_v8  ;;  %v1097_v60 = vmul.f32 %v2182_v41, %v945_v13  ;;  %vm933_vm2 = vweird.f32 %v1365_v37 }
 0x2b9   :  { %v950_v24 = vsub.f32 1.5, %v949_v16  ;;  %vm934_vm4 = vmor %vm932_vm3, %vm933_vm2 }
 0x2ba   :  { %v1367_v32 = vpop.eup %1366  ;;  %v928_v38 = vmul.f32 %v1365_v37, %v927_v61  ;;  %v1210_v12 = vsel %vm76_vm0, %v1166_v17, 0  ;;  %v1113_v1 = vmul.f32 %v1097_v60, %v1078_v42 }
 0x2bb   :  { %v951_v19 = vmul.f32 %v1363_v54, %v950_v24  ;;  %v917_v46 = vmul.f32 %v1367_v32, %v900_v11  ;;  %vm923_vm5 = vweird.f32 %v1367_v32 }
 0x2bc   :  { %v929_v29 = vmul.f32 0.5, %v928_v38  ;;  %1232 = vmatpush.bf16.xpose.msra.mxu2 %v1210_v12  ;;  %v1132_v53 = vadd.f32 %v2222_v63, %v1113_v1  ;;  %vm924_vm7 = vmor %vm922_vm6, %vm923_vm5 }
 0x2bd   :  { %v918_v39 = vmul.f32 %v1367_v32, %v917_v46  ;;  %v955_v28 = vsel %vm954_vm1, %v1363_v54, %v951_v19 }
 0x2be   :  { %v930_v35 = vsub.f32 1.5, %v929_v29  ;;  %v1098_v57 = vmul.f32 %v2182_v41, %v955_v28  ;;  %v1148_v22 = vmax.f32 %v1132_v53, 0.0 }
 0x2bf   :  { %v919_v33 = vmul.f32 0.5, %v918_v39 }
 0x2c0   :  { %v931_v43 = vmul.f32 %v1365_v37, %v930_v35  ;;  %v1114_v20 = vmul.f32 %v1098_v57, %v1079_v10 }
 0x2c1   :  { %v920_v52 = vsub.f32 1.5, %v919_v33 }
 0x2c2   :  { %v1133_v36 = vadd.f32 %v2222_v63, %v1114_v20  ;;  %v935_v30 = vsel %vm934_vm4, %v1365_v37, %v931_v43 }
 0x2c3   :  { %v921_v62 = vmul.f32 %v1367_v32, %v920_v52  ;;  %v1096_v15 = vmul.f32 %v2182_v41, %v935_v30 }
 0x2c4   :  { %v1149_v40 = vmax.f32 %v1133_v36, 0.0 }
 0x2c5   :  { %v925_v55 = vsel %vm924_vm7, %v1367_v32, %v921_v62  ;;  %v1112_v9 = vmul.f32 %v1096_v15, %v1077_v34 }
 0x2c6   :  { %v1165_v56 = vpack.c.bf16 %v1149_v40, %v1148_v22  ;;  %v1095_v21 = vmul.f32 %v2182_v41, %v925_v55 }
 0x2c7   :  { %v1131_v2 = vadd.f32 %v2222_v63, %v1112_v9 }
 0x2c8   :  { %v1207_v14 = vsel %vm76_vm0, %v1165_v56, 0  ;;  %v1111_v6 = vmul.f32 %v1095_v21, %v1076_v26 }
 0x2c9   :  { %1233 = vmatpush.bf16.xpose.msra.mxu2 %v1207_v14  ;;  %v1147_v7 = vmax.f32 %v1131_v2, 0.0 }
 0x2ca   :  { %v1130_v23 = vadd.f32 %v2222_v63, %v1111_v6 }
 0x2cc   :  { %v1146_v5 = vmax.f32 %v1130_v23, 0.0 }
 0x2ce   :  { %v1164_v44 = vpack.c.bf16 %v1147_v7, %v1146_v5 }
 0x2d0   :  { %v1204_v49 = vsel %vm76_vm0, %v1164_v44, 0 }
 0x2d1   :  { %1234 = vmatpush.bf16.xpose.msra.mxu2 %v1204_v49 }
 0x311   :  { %v1176_v4 = vpop.permute.xlu2 %1175 }
 0x318   :  { %v1192_v41 = vpop.trf.xlu1 }
 0x319   :  { %1285 = vmatmul.msk.bf16.vlgmr.msra.gmra.mxu2 %vm76_vm0, %v1192_v41 }
 0x39c   :  { %v1236_v63 = vpop.f32.mrf.mxu2 }
 0x39d   :  { %v1237_v50 = vadd.f32 %v1236_v63, %v1176_v4 }
 0x39f   :  { %1240 = vst [vmem:[#allocation2] sm:$0xf] %v1237_v50 }
 0x3a0   :  { %1251 = dma.vmem_to_hbm [thread:$0]  %s1247_s21, 64, %s1249_s24, [#allocation3]  }
 0x3a4   :  { %v1238_v54 = vpop.f32.mrf.mxu2 }
 0x3a5   :  { %1392 = dma.done.wait [#allocation3], 64  }
 0x3a6   :  { %1393 = vsyncadd [#allocation3], 4294967232 }
 0x3a7   :  { %1256 = vsyncpa [#allocation3], 1 }

</bundles_post_ra>
